<compile_context>
chip_gen: v7x
topology: tpu7x:2x2x1
jax: 0.10.0
libtpu: 0.0.40
codegen_flags: <defaults>
</compile_context>

<pallas_src>
import jax
import jax.numpy as jnp
from jax import lax
from jax.experimental import pallas as pl
from jax.experimental.pallas import tpu as pltpu


def seq2seq_kernel(x_ref, tgt_ref,
                   wih_e_ref, whh_e_ref, b_e_ref,
                   wih_d_ref, whh_d_ref, b_d_ref,
                   wfc_blk_ref, bfc_blk_ref,
                   out_ref):
    S = x_ref.shape[0]
    T = tgt_ref.shape[0]
    B = out_ref.shape[0]          # padded batch
    H = whh_e_ref.shape[0]        # hidden size

    # Hoist the (1, 4H) fused biases out of the recurrence (no per-step
    # re-broadcast of a (4,1,H) tensor).
    b_enc = b_e_ref[...]
    b_dec = b_d_ref[...]

    def lstm_step(x_t, h, c, wih_ref, whh_ref, b):
        # One fused gate matmul pair: (B, in) @ (in, 4H) + (B, H) @ (H, 4H).
        gates = (jnp.dot(x_t, wih_ref[...], preferred_element_type=jnp.float32)
                 + jnp.dot(h, whh_ref[...], preferred_element_type=jnp.float32)
                 + b)                                   # (B, 4H)
        i = jax.nn.sigmoid(gates[:, 0 * H:1 * H])
        f = jax.nn.sigmoid(gates[:, 1 * H:2 * H])
        g = jnp.tanh(gates[:, 2 * H:3 * H])
        o = jax.nn.sigmoid(gates[:, 3 * H:4 * H])
        c_new = f * c + i * g
        h_new = o * jnp.tanh(c_new)
        return h_new, c_new

    # zero initial hidden/cell state (PyTorch default when no (h0, c0) is given)
    h = jnp.zeros((B, H), jnp.float32)
    c = jnp.zeros((B, H), jnp.float32)

    # ---- encoder: statically unrolled scan over the input sequence ----
    for t in range(S):
        h, c = lstm_step(x_ref[t], h, c, wih_e_ref, whh_e_ref, b_enc)

    # ---- decoder: statically unrolled; keep per-step hidden states live ----
    dec_hs = []
    for t in range(T):
        h, c = lstm_step(tgt_ref[t], h, c, wih_d_ref, whh_d_ref, b_dec)
        dec_hs.append(h)

    # ---- fc projection, hoisted out of the loop ----
    # (B, T*H) slab (batch-major) x block-diag(W_fc) (T*H, T*O) -> (B, T*O),
    # which is exactly the (B, T, O) output in row-major order: one matmul,
    # one contiguous store, no transpose anywhere.
    hs = jnp.concatenate(dec_hs, axis=1)                       # (B, T*H)
    logits = (jnp.dot(hs, wfc_blk_ref[...],
                      preferred_element_type=jnp.float32)
              + bfc_blk_ref[...])                              # (B, T*O)
    out_ref[...] = logits.astype(out_ref.dtype)


def seq2seq_forward(inputs, targets, params):
    (wih_e, whh_e, b_e, wih_d, whh_d, b_d, wfc, bfc) = params
    S, B, _ = inputs.shape
    T = targets.shape[0]
    H = whh_e.shape[0]
    O = wfc.shape[1]

    # Pad the batch to the 8-sublane granularity so every per-step vreg op and
    # the final store are unmasked in the sublane dimension.
    B_pad = ((B + 7) // 8) * 8
    if B_pad != B:
        inputs = jnp.pad(inputs, ((0, 0), (0, B_pad - B), (0, 0)))
        targets = jnp.pad(targets, ((0, 0), (0, B_pad - B), (0, 0)))

    # Block-diagonal fc weight: projects all T decoder steps in one matmul and
    # lands the result already in (B, T, O) row-major order. (T is tiny, so the
    # T x redundancy in MXU flops is negligible.)
    wfc_blk = jnp.kron(jnp.eye(T, dtype=wfc.dtype), wfc)       # (T*H, T*O)
    bfc_blk = jnp.tile(bfc, (1, T))                            # (1, T*O)

    vmem = pl.BlockSpec(memory_space=pltpu.MemorySpace.VMEM)
    out_flat = pl.pallas_call(
        seq2seq_kernel,
        out_shape=jax.ShapeDtypeStruct((B_pad, T * O), jnp.float32),
        in_specs=[vmem] * 10,
        out_specs=vmem,
        compiler_params=pltpu.CompilerParams(
            vmem_limit_bytes=32 * 1024 * 1024),
    )(inputs, targets, wih_e, whh_e, b_e, wih_d, whh_d, b_d, wfc_blk, bfc_blk)

    # Contiguous reshape (pure metadata, no transpose / extra HBM round trip),
    # then drop the padded batch rows.
    return out_flat.reshape(B_pad, T, O)[:B]


# ---------- pure-JAX reference (for correctness check) ----------
def _lstm_ref(xs, h, c, wih, whh, b):
    H = h.shape[-1]

    def step(carry, x_t):
        h, c = carry
        gates = x_t @ wih + h @ whh + b
        i = jax.nn.sigmoid(gates[:, 0 * H:1 * H])
        f = jax.nn.sigmoid(gates[:, 1 * H:2 * H])
        g = jnp.tanh(gates[:, 2 * H:3 * H])
        o = jax.nn.sigmoid(gates[:, 3 * H:4 * H])
        c = f * c + i * g
        h = o * jnp.tanh(c)
        return (h, c), h

    (h, c), hs = lax.scan(step, (h, c), xs)
    return hs, h, c


def seq2seq_ref(inputs, targets, params):
    (wih_e, whh_e, b_e, wih_d, whh_d, b_d, wfc, bfc) = params
    B = inputs.shape[1]
    H = whh_e.shape[0]
    h0 = jnp.zeros((B, H), jnp.float32)
    c0 = jnp.zeros((B, H), jnp.float32)
    _, h, c = _lstm_ref(inputs, h0, c0, wih_e, whh_e, b_e)
    hs, _, _ = _lstm_ref(targets, h, c, wih_d, whh_d, b_d)
    logits = hs @ wfc + bfc            # (T, B, O)
    return jnp.transpose(logits, (1, 0, 2))


if __name__ == "__main__":
    # vocab = sorted(set(input_seqs + target_seqs)) -> 8 unique words
    B, S, T = 2, 5, 4
    I = 8      # input_size  = len(vocab)
    H = 128    # hidden_size (spec value; also exactly one 128-lane vreg width)
    O = 8      # output_size = len(vocab)

    key = jax.random.PRNGKey(0)
    ks = jax.random.split(key, 10)
    inputs = jax.random.normal(ks[0], (S, B, I), jnp.float32)
    targets = jax.random.normal(ks[1], (T, B, H), jnp.float32)

    # Fused-gate weight layout (PyTorch gate order i, f, g, o along last dim);
    # bias is b_ih + b_hh folded into one (1, 4H) row.
    scale = 0.1
    wih_e = jax.random.normal(ks[2], (I, 4 * H), jnp.float32) * scale
    whh_e = jax.random.normal(ks[3], (H, 4 * H), jnp.float32) * scale
    b_e   = jax.random.normal(ks[4], (1, 4 * H), jnp.float32) * scale
    wih_d = jax.random.normal(ks[5], (H, 4 * H), jnp.float32) * scale
    whh_d = jax.random.normal(ks[6], (H, 4 * H), jnp.float32) * scale
    b_d   = jax.random.normal(ks[7], (1, 4 * H), jnp.float32) * scale
    wfc   = jax.random.normal(ks[8], (H, O), jnp.float32) * scale
    bfc   = jax.random.normal(ks[9], (1, O), jnp.float32) * scale
    params = (wih_e, whh_e, b_e, wih_d, whh_d, b_d, wfc, bfc)

    out = jax.block_until_ready(seq2seq_forward(inputs, targets, params))
    ref = jax.block_until_ready(seq2seq_ref(inputs, targets, params))

    assert out.shape == (B, T, O), out.shape
    err = jnp.max(jnp.abs(out - ref))
    assert jnp.allclose(out, ref, atol=1e-4, rtol=1e-4), f"max abs err = {err}"
    print("KERNEL_OK")
</pallas_src>

<mosaic_0001>
module attributes {stable_mosaic.version = 11 : i64} {
  func.func @seq2seq_kernel(%arg0: memref<5x8x8xf32, #tpu.memory_space<vmem>>, %arg1: memref<4x8x128xf32, #tpu.memory_space<vmem>>, %arg2: memref<8x512xf32, #tpu.memory_space<vmem>>, %arg3: memref<128x512xf32, #tpu.memory_space<vmem>>, %arg4: memref<1x512xf32, #tpu.memory_space<vmem>>, %arg5: memref<128x512xf32, #tpu.memory_space<vmem>>, %arg6: memref<128x512xf32, #tpu.memory_space<vmem>>, %arg7: memref<1x512xf32, #tpu.memory_space<vmem>>, %arg8: memref<512x32xf32, #tpu.memory_space<vmem>>, %arg9: memref<1x32xf32, #tpu.memory_space<vmem>>, %arg10: memref<8x32xf32, #tpu.memory_space<vmem>>) attributes {dimension_semantics = [], scalar_prefetch = 0 : i64, scratch_operands = 0 : i64, tpu.core_type = #tpu.core_type<tc>} {
    %c0 = arith.constant 0 : index
    %c0_0 = arith.constant 0 : index
    %0 = vector.load %arg4[%c0, %c0_0] : memref<1x512xf32, #tpu.memory_space<vmem>>, vector<1x512xf32>
    %c0_1 = arith.constant 0 : index
    %c0_2 = arith.constant 0 : index
    %1 = vector.load %arg7[%c0_1, %c0_2] : memref<1x512xf32, #tpu.memory_space<vmem>>, vector<1x512xf32>
    %cst = arith.constant 0.000000e+00 : f32
    %2 = vector.broadcast %cst : f32 to vector<8x128xf32>
    %cst_3 = arith.constant 0.000000e+00 : f32
    %3 = vector.broadcast %cst_3 : f32 to vector<8x128xf32>
    %c0_4 = arith.constant 0 : index
    %c0_5 = arith.constant 0 : index
    %c0_6 = arith.constant 0 : index
    %4 = vector.load %arg0[%c0_4, %c0_5, %c0_6] : memref<5x8x8xf32, #tpu.memory_space<vmem>>, vector<1x8x8xf32>
    %5 = vector.shape_cast %4 : vector<1x8x8xf32> to vector<8x8xf32>
    %c0_7 = arith.constant 0 : index
    %c0_8 = arith.constant 0 : index
    %6 = vector.load %arg2[%c0_7, %c0_8] : memref<8x512xf32, #tpu.memory_space<vmem>>, vector<8x512xf32>
    %cst_9 = arith.constant dense<0.000000e+00> : vector<8x512xf32>
    %7 = tpu.matmul %5, %6, %cst_9 {dimension_numbers = #tpu.dot_dimension_numbers<[1], [0], [0], [1], [0, 0, 1, 1], [], []>} : vector<8x8xf32>, vector<8x512xf32>, vector<8x512xf32> -> vector<8x512xf32>
    %c0_10 = arith.constant 0 : index
    %c0_11 = arith.constant 0 : index
    %8 = vector.load %arg3[%c0_10, %c0_11] : memref<128x512xf32, #tpu.memory_space<vmem>>, vector<128x512xf32>
    %cst_12 = arith.constant dense<0.000000e+00> : vector<8x512xf32>
    %9 = tpu.matmul %2, %8, %cst_12 {dimension_numbers = #tpu.dot_dimension_numbers<[1], [0], [0], [1], [0, 0, 1, 1], [], []>} : vector<8x128xf32>, vector<128x512xf32>, vector<8x512xf32> -> vector<8x512xf32>
    %10 = arith.addf %7, %9 : vector<8x512xf32>
    %11 = vector.broadcast %0 : vector<1x512xf32> to vector<8x512xf32>
    %12 = arith.addf %10, %11 : vector<8x512xf32>
    %13 = vector.extract_strided_slice %12 {offsets = [0, 0], sizes = [8, 128], strides = [1, 1]} : vector<8x512xf32> to vector<8x128xf32>
    %14 = arith.negf %13 : vector<8x128xf32>
    %15 = math.exp %14 : vector<8x128xf32>
    %cst_13 = arith.constant 1.000000e+00 : f32
    %16 = vector.broadcast %cst_13 : f32 to vector<8x128xf32>
    %17 = arith.addf %16, %15 : vector<8x128xf32>
    %18 = arith.divf %16, %17 : vector<8x128xf32>
    %19 = vector.extract_strided_slice %12 {offsets = [0, 128], sizes = [8, 128], strides = [1, 1]} : vector<8x512xf32> to vector<8x128xf32>
    %20 = arith.negf %19 : vector<8x128xf32>
    %21 = math.exp %20 : vector<8x128xf32>
    %cst_14 = arith.constant 1.000000e+00 : f32
    %22 = vector.broadcast %cst_14 : f32 to vector<8x128xf32>
    %23 = arith.addf %22, %21 : vector<8x128xf32>
    %24 = arith.divf %22, %23 : vector<8x128xf32>
    %25 = vector.extract_strided_slice %12 {offsets = [0, 256], sizes = [8, 128], strides = [1, 1]} : vector<8x512xf32> to vector<8x128xf32>
    %26 = math.tanh %25 : vector<8x128xf32>
    %27 = vector.extract_strided_slice %12 {offsets = [0, 384], sizes = [8, 128], strides = [1, 1]} : vector<8x512xf32> to vector<8x128xf32>
    %28 = arith.negf %27 : vector<8x128xf32>
    %29 = math.exp %28 : vector<8x128xf32>
    %cst_15 = arith.constant 1.000000e+00 : f32
    %30 = vector.broadcast %cst_15 : f32 to vector<8x128xf32>
    %31 = arith.addf %30, %29 : vector<8x128xf32>
    %32 = arith.divf %30, %31 : vector<8x128xf32>
    %33 = arith.mulf %24, %3 : vector<8x128xf32>
    %34 = arith.mulf %18, %26 : vector<8x128xf32>
    %35 = arith.addf %33, %34 : vector<8x128xf32>
    %36 = math.tanh %35 : vector<8x128xf32>
    %37 = arith.mulf %32, %36 : vector<8x128xf32>
    %c1 = arith.constant 1 : index
    %c0_16 = arith.constant 0 : index
    %c0_17 = arith.constant 0 : index
    %38 = vector.load %arg0[%c1, %c0_16, %c0_17] : memref<5x8x8xf32, #tpu.memory_space<vmem>>, vector<1x8x8xf32>
    %39 = vector.shape_cast %38 : vector<1x8x8xf32> to vector<8x8xf32>
    %c0_18 = arith.constant 0 : index
    %c0_19 = arith.constant 0 : index
    %40 = vector.load %arg2[%c0_18, %c0_19] : memref<8x512xf32, #tpu.memory_space<vmem>>, vector<8x512xf32>
    %cst_20 = arith.constant dense<0.000000e+00> : vector<8x512xf32>
    %41 = tpu.matmul %39, %40, %cst_20 {dimension_numbers = #tpu.dot_dimension_numbers<[1], [0], [0], [1], [0, 0, 1, 1], [], []>} : vector<8x8xf32>, vector<8x512xf32>, vector<8x512xf32> -> vector<8x512xf32>
    %c0_21 = arith.constant 0 : index
    %c0_22 = arith.constant 0 : index
    %42 = vector.load %arg3[%c0_21, %c0_22] : memref<128x512xf32, #tpu.memory_space<vmem>>, vector<128x512xf32>
    %cst_23 = arith.constant dense<0.000000e+00> : vector<8x512xf32>
    %43 = tpu.matmul %37, %42, %cst_23 {dimension_numbers = #tpu.dot_dimension_numbers<[1], [0], [0], [1], [0, 0, 1, 1], [], []>} : vector<8x128xf32>, vector<128x512xf32>, vector<8x512xf32> -> vector<8x512xf32>
    %44 = arith.addf %41, %43 : vector<8x512xf32>
    %45 = vector.broadcast %0 : vector<1x512xf32> to vector<8x512xf32>
    %46 = arith.addf %44, %45 : vector<8x512xf32>
    %47 = vector.extract_strided_slice %46 {offsets = [0, 0], sizes = [8, 128], strides = [1, 1]} : vector<8x512xf32> to vector<8x128xf32>
    %48 = arith.negf %47 : vector<8x128xf32>
    %49 = math.exp %48 : vector<8x128xf32>
    %cst_24 = arith.constant 1.000000e+00 : f32
    %50 = vector.broadcast %cst_24 : f32 to vector<8x128xf32>
    %51 = arith.addf %50, %49 : vector<8x128xf32>
    %52 = arith.divf %50, %51 : vector<8x128xf32>
    %53 = vector.extract_strided_slice %46 {offsets = [0, 128], sizes = [8, 128], strides = [1, 1]} : vector<8x512xf32> to vector<8x128xf32>
    %54 = arith.negf %53 : vector<8x128xf32>
    %55 = math.exp %54 : vector<8x128xf32>
    %cst_25 = arith.constant 1.000000e+00 : f32
    %56 = vector.broadcast %cst_25 : f32 to vector<8x128xf32>
    %57 = arith.addf %56, %55 : vector<8x128xf32>
    %58 = arith.divf %56, %57 : vector<8x128xf32>
    %59 = vector.extract_strided_slice %46 {offsets = [0, 256], sizes = [8, 128], strides = [1, 1]} : vector<8x512xf32> to vector<8x128xf32>
    %60 = math.tanh %59 : vector<8x128xf32>
    %61 = vector.extract_strided_slice %46 {offsets = [0, 384], sizes = [8, 128], strides = [1, 1]} : vector<8x512xf32> to vector<8x128xf32>
    %62 = arith.negf %61 : vector<8x128xf32>
    %63 = math.exp %62 : vector<8x128xf32>
    %cst_26 = arith.constant 1.000000e+00 : f32
    %64 = vector.broadcast %cst_26 : f32 to vector<8x128xf32>
    %65 = arith.addf %64, %63 : vector<8x128xf32>
    %66 = arith.divf %64, %65 : vector<8x128xf32>
    %67 = arith.mulf %58, %35 : vector<8x128xf32>
    %68 = arith.mulf %52, %60 : vector<8x128xf32>
    %69 = arith.addf %67, %68 : vector<8x128xf32>
    %70 = math.tanh %69 : vector<8x128xf32>
    %71 = arith.mulf %66, %70 : vector<8x128xf32>
    %c2 = arith.constant 2 : index
    %c0_27 = arith.constant 0 : index
    %c0_28 = arith.constant 0 : index
    %72 = vector.load %arg0[%c2, %c0_27, %c0_28] : memref<5x8x8xf32, #tpu.memory_space<vmem>>, vector<1x8x8xf32>
    %73 = vector.shape_cast %72 : vector<1x8x8xf32> to vector<8x8xf32>
    %c0_29 = arith.constant 0 : index
    %c0_30 = arith.constant 0 : index
    %74 = vector.load %arg2[%c0_29, %c0_30] : memref<8x512xf32, #tpu.memory_space<vmem>>, vector<8x512xf32>
    %cst_31 = arith.constant dense<0.000000e+00> : vector<8x512xf32>
    %75 = tpu.matmul %73, %74, %cst_31 {dimension_numbers = #tpu.dot_dimension_numbers<[1], [0], [0], [1], [0, 0, 1, 1], [], []>} : vector<8x8xf32>, vector<8x512xf32>, vector<8x512xf32> -> vector<8x512xf32>
    %c0_32 = arith.constant 0 : index
    %c0_33 = arith.constant 0 : index
    %76 = vector.load %arg3[%c0_32, %c0_33] : memref<128x512xf32, #tpu.memory_space<vmem>>, vector<128x512xf32>
    %cst_34 = arith.constant dense<0.000000e+00> : vector<8x512xf32>
    %77 = tpu.matmul %71, %76, %cst_34 {dimension_numbers = #tpu.dot_dimension_numbers<[1], [0], [0], [1], [0, 0, 1, 1], [], []>} : vector<8x128xf32>, vector<128x512xf32>, vector<8x512xf32> -> vector<8x512xf32>
    %78 = arith.addf %75, %77 : vector<8x512xf32>
    %79 = vector.broadcast %0 : vector<1x512xf32> to vector<8x512xf32>
    %80 = arith.addf %78, %79 : vector<8x512xf32>
    %81 = vector.extract_strided_slice %80 {offsets = [0, 0], sizes = [8, 128], strides = [1, 1]} : vector<8x512xf32> to vector<8x128xf32>
    %82 = arith.negf %81 : vector<8x128xf32>
    %83 = math.exp %82 : vector<8x128xf32>
    %cst_35 = arith.constant 1.000000e+00 : f32
    %84 = vector.broadcast %cst_35 : f32 to vector<8x128xf32>
    %85 = arith.addf %84, %83 : vector<8x128xf32>
    %86 = arith.divf %84, %85 : vector<8x128xf32>
    %87 = vector.extract_strided_slice %80 {offsets = [0, 128], sizes = [8, 128], strides = [1, 1]} : vector<8x512xf32> to vector<8x128xf32>
    %88 = arith.negf %87 : vector<8x128xf32>
    %89 = math.exp %88 : vector<8x128xf32>
    %cst_36 = arith.constant 1.000000e+00 : f32
    %90 = vector.broadcast %cst_36 : f32 to vector<8x128xf32>
    %91 = arith.addf %90, %89 : vector<8x128xf32>
    %92 = arith.divf %90, %91 : vector<8x128xf32>
    %93 = vector.extract_strided_slice %80 {offsets = [0, 256], sizes = [8, 128], strides = [1, 1]} : vector<8x512xf32> to vector<8x128xf32>
    %94 = math.tanh %93 : vector<8x128xf32>
    %95 = vector.extract_strided_slice %80 {offsets = [0, 384], sizes = [8, 128], strides = [1, 1]} : vector<8x512xf32> to vector<8x128xf32>
    %96 = arith.negf %95 : vector<8x128xf32>
    %97 = math.exp %96 : vector<8x128xf32>
    %cst_37 = arith.constant 1.000000e+00 : f32
    %98 = vector.broadcast %cst_37 : f32 to vector<8x128xf32>
    %99 = arith.addf %98, %97 : vector<8x128xf32>
    %100 = arith.divf %98, %99 : vector<8x128xf32>
    %101 = arith.mulf %92, %69 : vector<8x128xf32>
    %102 = arith.mulf %86, %94 : vector<8x128xf32>
    %103 = arith.addf %101, %102 : vector<8x128xf32>
    %104 = math.tanh %103 : vector<8x128xf32>
    %105 = arith.mulf %100, %104 : vector<8x128xf32>
    %c3 = arith.constant 3 : index
    %c0_38 = arith.constant 0 : index
    %c0_39 = arith.constant 0 : index
    %106 = vector.load %arg0[%c3, %c0_38, %c0_39] : memref<5x8x8xf32, #tpu.memory_space<vmem>>, vector<1x8x8xf32>
    %107 = vector.shape_cast %106 : vector<1x8x8xf32> to vector<8x8xf32>
    %c0_40 = arith.constant 0 : index
    %c0_41 = arith.constant 0 : index
    %108 = vector.load %arg2[%c0_40, %c0_41] : memref<8x512xf32, #tpu.memory_space<vmem>>, vector<8x512xf32>
    %cst_42 = arith.constant dense<0.000000e+00> : vector<8x512xf32>
    %109 = tpu.matmul %107, %108, %cst_42 {dimension_numbers = #tpu.dot_dimension_numbers<[1], [0], [0], [1], [0, 0, 1, 1], [], []>} : vector<8x8xf32>, vector<8x512xf32>, vector<8x512xf32> -> vector<8x512xf32>
    %c0_43 = arith.constant 0 : index
    %c0_44 = arith.constant 0 : index
    %110 = vector.load %arg3[%c0_43, %c0_44] : memref<128x512xf32, #tpu.memory_space<vmem>>, vector<128x512xf32>
    %cst_45 = arith.constant dense<0.000000e+00> : vector<8x512xf32>
    %111 = tpu.matmul %105, %110, %cst_45 {dimension_numbers = #tpu.dot_dimension_numbers<[1], [0], [0], [1], [0, 0, 1, 1], [], []>} : vector<8x128xf32>, vector<128x512xf32>, vector<8x512xf32> -> vector<8x512xf32>
    %112 = arith.addf %109, %111 : vector<8x512xf32>
    %113 = vector.broadcast %0 : vector<1x512xf32> to vector<8x512xf32>
    %114 = arith.addf %112, %113 : vector<8x512xf32>
    %115 = vector.extract_strided_slice %114 {offsets = [0, 0], sizes = [8, 128], strides = [1, 1]} : vector<8x512xf32> to vector<8x128xf32>
    %116 = arith.negf %115 : vector<8x128xf32>
    %117 = math.exp %116 : vector<8x128xf32>
    %cst_46 = arith.constant 1.000000e+00 : f32
    %118 = vector.broadcast %cst_46 : f32 to vector<8x128xf32>
    %119 = arith.addf %118, %117 : vector<8x128xf32>
    %120 = arith.divf %118, %119 : vector<8x128xf32>
    %121 = vector.extract_strided_slice %114 {offsets = [0, 128], sizes = [8, 128], strides = [1, 1]} : vector<8x512xf32> to vector<8x128xf32>
    %122 = arith.negf %121 : vector<8x128xf32>
    %123 = math.exp %122 : vector<8x128xf32>
    %cst_47 = arith.constant 1.000000e+00 : f32
    %124 = vector.broadcast %cst_47 : f32 to vector<8x128xf32>
    %125 = arith.addf %124, %123 : vector<8x128xf32>
    %126 = arith.divf %124, %125 : vector<8x128xf32>
    %127 = vector.extract_strided_slice %114 {offsets = [0, 256], sizes = [8, 128], strides = [1, 1]} : vector<8x512xf32> to vector<8x128xf32>
    %128 = math.tanh %127 : vector<8x128xf32>
    %129 = vector.extract_strided_slice %114 {offsets = [0, 384], sizes = [8, 128], strides = [1, 1]} : vector<8x512xf32> to vector<8x128xf32>
    %130 = arith.negf %129 : vector<8x128xf32>
    %131 = math.exp %130 : vector<8x128xf32>
    %cst_48 = arith.constant 1.000000e+00 : f32
    %132 = vector.broadcast %cst_48 : f32 to vector<8x128xf32>
    %133 = arith.addf %132, %131 : vector<8x128xf32>
    %134 = arith.divf %132, %133 : vector<8x128xf32>
    %135 = arith.mulf %126, %103 : vector<8x128xf32>
    %136 = arith.mulf %120, %128 : vector<8x128xf32>
    %137 = arith.addf %135, %136 : vector<8x128xf32>
    %138 = math.tanh %137 : vector<8x128xf32>
    %139 = arith.mulf %134, %138 : vector<8x128xf32>
    %c4 = arith.constant 4 : index
    %c0_49 = arith.constant 0 : index
    %c0_50 = arith.constant 0 : index
    %140 = vector.load %arg0[%c4, %c0_49, %c0_50] : memref<5x8x8xf32, #tpu.memory_space<vmem>>, vector<1x8x8xf32>
    %141 = vector.shape_cast %140 : vector<1x8x8xf32> to vector<8x8xf32>
    %c0_51 = arith.constant 0 : index
    %c0_52 = arith.constant 0 : index
    %142 = vector.load %arg2[%c0_51, %c0_52] : memref<8x512xf32, #tpu.memory_space<vmem>>, vector<8x512xf32>
    %cst_53 = arith.constant dense<0.000000e+00> : vector<8x512xf32>
    %143 = tpu.matmul %141, %142, %cst_53 {dimension_numbers = #tpu.dot_dimension_numbers<[1], [0], [0], [1], [0, 0, 1, 1], [], []>} : vector<8x8xf32>, vector<8x512xf32>, vector<8x512xf32> -> vector<8x512xf32>
    %c0_54 = arith.constant 0 : index
    %c0_55 = arith.constant 0 : index
    %144 = vector.load %arg3[%c0_54, %c0_55] : memref<128x512xf32, #tpu.memory_space<vmem>>, vector<128x512xf32>
    %cst_56 = arith.constant dense<0.000000e+00> : vector<8x512xf32>
    %145 = tpu.matmul %139, %144, %cst_56 {dimension_numbers = #tpu.dot_dimension_numbers<[1], [0], [0], [1], [0, 0, 1, 1], [], []>} : vector<8x128xf32>, vector<128x512xf32>, vector<8x512xf32> -> vector<8x512xf32>
    %146 = arith.addf %143, %145 : vector<8x512xf32>
    %147 = vector.broadcast %0 : vector<1x512xf32> to vector<8x512xf32>
    %148 = arith.addf %146, %147 : vector<8x512xf32>
    %149 = vector.extract_strided_slice %148 {offsets = [0, 0], sizes = [8, 128], strides = [1, 1]} : vector<8x512xf32> to vector<8x128xf32>
    %150 = arith.negf %149 : vector<8x128xf32>
    %151 = math.exp %150 : vector<8x128xf32>
    %cst_57 = arith.constant 1.000000e+00 : f32
    %152 = vector.broadcast %cst_57 : f32 to vector<8x128xf32>
    %153 = arith.addf %152, %151 : vector<8x128xf32>
    %154 = arith.divf %152, %153 : vector<8x128xf32>
    %155 = vector.extract_strided_slice %148 {offsets = [0, 128], sizes = [8, 128], strides = [1, 1]} : vector<8x512xf32> to vector<8x128xf32>
    %156 = arith.negf %155 : vector<8x128xf32>
    %157 = math.exp %156 : vector<8x128xf32>
    %cst_58 = arith.constant 1.000000e+00 : f32
    %158 = vector.broadcast %cst_58 : f32 to vector<8x128xf32>
    %159 = arith.addf %158, %157 : vector<8x128xf32>
    %160 = arith.divf %158, %159 : vector<8x128xf32>
    %161 = vector.extract_strided_slice %148 {offsets = [0, 256], sizes = [8, 128], strides = [1, 1]} : vector<8x512xf32> to vector<8x128xf32>
    %162 = math.tanh %161 : vector<8x128xf32>
    %163 = vector.extract_strided_slice %148 {offsets = [0, 384], sizes = [8, 128], strides = [1, 1]} : vector<8x512xf32> to vector<8x128xf32>
    %164 = arith.negf %163 : vector<8x128xf32>
    %165 = math.exp %164 : vector<8x128xf32>
    %cst_59 = arith.constant 1.000000e+00 : f32
    %166 = vector.broadcast %cst_59 : f32 to vector<8x128xf32>
    %167 = arith.addf %166, %165 : vector<8x128xf32>
    %168 = arith.divf %166, %167 : vector<8x128xf32>
    %169 = arith.mulf %160, %137 : vector<8x128xf32>
    %170 = arith.mulf %154, %162 : vector<8x128xf32>
    %171 = arith.addf %169, %170 : vector<8x128xf32>
    %172 = math.tanh %171 : vector<8x128xf32>
    %173 = arith.mulf %168, %172 : vector<8x128xf32>
    %c0_60 = arith.constant 0 : index
    %c0_61 = arith.constant 0 : index
    %c0_62 = arith.constant 0 : index
    %174 = vector.load %arg1[%c0_60, %c0_61, %c0_62] : memref<4x8x128xf32, #tpu.memory_space<vmem>>, vector<1x8x128xf32>
    %175 = vector.shape_cast %174 : vector<1x8x128xf32> to vector<8x128xf32>
    %c0_63 = arith.constant 0 : index
    %c0_64 = arith.constant 0 : index
    %176 = vector.load %arg5[%c0_63, %c0_64] : memref<128x512xf32, #tpu.memory_space<vmem>>, vector<128x512xf32>
    %cst_65 = arith.constant dense<0.000000e+00> : vector<8x512xf32>
    %177 = tpu.matmul %175, %176, %cst_65 {dimension_numbers = #tpu.dot_dimension_numbers<[1], [0], [0], [1], [0, 0, 1, 1], [], []>} : vector<8x128xf32>, vector<128x512xf32>, vector<8x512xf32> -> vector<8x512xf32>
    %c0_66 = arith.constant 0 : index
    %c0_67 = arith.constant 0 : index
    %178 = vector.load %arg6[%c0_66, %c0_67] : memref<128x512xf32, #tpu.memory_space<vmem>>, vector<128x512xf32>
    %cst_68 = arith.constant dense<0.000000e+00> : vector<8x512xf32>
    %179 = tpu.matmul %173, %178, %cst_68 {dimension_numbers = #tpu.dot_dimension_numbers<[1], [0], [0], [1], [0, 0, 1, 1], [], []>} : vector<8x128xf32>, vector<128x512xf32>, vector<8x512xf32> -> vector<8x512xf32>
    %180 = arith.addf %177, %179 : vector<8x512xf32>
    %181 = vector.broadcast %1 : vector<1x512xf32> to vector<8x512xf32>
    %182 = arith.addf %180, %181 : vector<8x512xf32>
    %183 = vector.extract_strided_slice %182 {offsets = [0, 0], sizes = [8, 128], strides = [1, 1]} : vector<8x512xf32> to vector<8x128xf32>
    %184 = arith.negf %183 : vector<8x128xf32>
    %185 = math.exp %184 : vector<8x128xf32>
    %cst_69 = arith.constant 1.000000e+00 : f32
    %186 = vector.broadcast %cst_69 : f32 to vector<8x128xf32>
    %187 = arith.addf %186, %185 : vector<8x128xf32>
    %188 = arith.divf %186, %187 : vector<8x128xf32>
    %189 = vector.extract_strided_slice %182 {offsets = [0, 128], sizes = [8, 128], strides = [1, 1]} : vector<8x512xf32> to vector<8x128xf32>
    %190 = arith.negf %189 : vector<8x128xf32>
    %191 = math.exp %190 : vector<8x128xf32>
    %cst_70 = arith.constant 1.000000e+00 : f32
    %192 = vector.broadcast %cst_70 : f32 to vector<8x128xf32>
    %193 = arith.addf %192, %191 : vector<8x128xf32>
    %194 = arith.divf %192, %193 : vector<8x128xf32>
    %195 = vector.extract_strided_slice %182 {offsets = [0, 256], sizes = [8, 128], strides = [1, 1]} : vector<8x512xf32> to vector<8x128xf32>
    %196 = math.tanh %195 : vector<8x128xf32>
    %197 = vector.extract_strided_slice %182 {offsets = [0, 384], sizes = [8, 128], strides = [1, 1]} : vector<8x512xf32> to vector<8x128xf32>
    %198 = arith.negf %197 : vector<8x128xf32>
    %199 = math.exp %198 : vector<8x128xf32>
    %cst_71 = arith.constant 1.000000e+00 : f32
    %200 = vector.broadcast %cst_71 : f32 to vector<8x128xf32>
    %201 = arith.addf %200, %199 : vector<8x128xf32>
    %202 = arith.divf %200, %201 : vector<8x128xf32>
    %203 = arith.mulf %194, %171 : vector<8x128xf32>
    %204 = arith.mulf %188, %196 : vector<8x128xf32>
    %205 = arith.addf %203, %204 : vector<8x128xf32>
    %206 = math.tanh %205 : vector<8x128xf32>
    %207 = arith.mulf %202, %206 : vector<8x128xf32>
    %c1_72 = arith.constant 1 : index
    %c0_73 = arith.constant 0 : index
    %c0_74 = arith.constant 0 : index
    %208 = vector.load %arg1[%c1_72, %c0_73, %c0_74] : memref<4x8x128xf32, #tpu.memory_space<vmem>>, vector<1x8x128xf32>
    %209 = vector.shape_cast %208 : vector<1x8x128xf32> to vector<8x128xf32>
    %c0_75 = arith.constant 0 : index
    %c0_76 = arith.constant 0 : index
    %210 = vector.load %arg5[%c0_75, %c0_76] : memref<128x512xf32, #tpu.memory_space<vmem>>, vector<128x512xf32>
    %cst_77 = arith.constant dense<0.000000e+00> : vector<8x512xf32>
    %211 = tpu.matmul %209, %210, %cst_77 {dimension_numbers = #tpu.dot_dimension_numbers<[1], [0], [0], [1], [0, 0, 1, 1], [], []>} : vector<8x128xf32>, vector<128x512xf32>, vector<8x512xf32> -> vector<8x512xf32>
    %c0_78 = arith.constant 0 : index
    %c0_79 = arith.constant 0 : index
    %212 = vector.load %arg6[%c0_78, %c0_79] : memref<128x512xf32, #tpu.memory_space<vmem>>, vector<128x512xf32>
    %cst_80 = arith.constant dense<0.000000e+00> : vector<8x512xf32>
    %213 = tpu.matmul %207, %212, %cst_80 {dimension_numbers = #tpu.dot_dimension_numbers<[1], [0], [0], [1], [0, 0, 1, 1], [], []>} : vector<8x128xf32>, vector<128x512xf32>, vector<8x512xf32> -> vector<8x512xf32>
    %214 = arith.addf %211, %213 : vector<8x512xf32>
    %215 = vector.broadcast %1 : vector<1x512xf32> to vector<8x512xf32>
    %216 = arith.addf %214, %215 : vector<8x512xf32>
    %217 = vector.extract_strided_slice %216 {offsets = [0, 0], sizes = [8, 128], strides = [1, 1]} : vector<8x512xf32> to vector<8x128xf32>
    %218 = arith.negf %217 : vector<8x128xf32>
    %219 = math.exp %218 : vector<8x128xf32>
    %cst_81 = arith.constant 1.000000e+00 : f32
    %220 = vector.broadcast %cst_81 : f32 to vector<8x128xf32>
    %221 = arith.addf %220, %219 : vector<8x128xf32>
    %222 = arith.divf %220, %221 : vector<8x128xf32>
    %223 = vector.extract_strided_slice %216 {offsets = [0, 128], sizes = [8, 128], strides = [1, 1]} : vector<8x512xf32> to vector<8x128xf32>
    %224 = arith.negf %223 : vector<8x128xf32>
    %225 = math.exp %224 : vector<8x128xf32>
    %cst_82 = arith.constant 1.000000e+00 : f32
    %226 = vector.broadcast %cst_82 : f32 to vector<8x128xf32>
    %227 = arith.addf %226, %225 : vector<8x128xf32>
    %228 = arith.divf %226, %227 : vector<8x128xf32>
    %229 = vector.extract_strided_slice %216 {offsets = [0, 256], sizes = [8, 128], strides = [1, 1]} : vector<8x512xf32> to vector<8x128xf32>
    %230 = math.tanh %229 : vector<8x128xf32>
    %231 = vector.extract_strided_slice %216 {offsets = [0, 384], sizes = [8, 128], strides = [1, 1]} : vector<8x512xf32> to vector<8x128xf32>
    %232 = arith.negf %231 : vector<8x128xf32>
    %233 = math.exp %232 : vector<8x128xf32>
    %cst_83 = arith.constant 1.000000e+00 : f32
    %234 = vector.broadcast %cst_83 : f32 to vector<8x128xf32>
    %235 = arith.addf %234, %233 : vector<8x128xf32>
    %236 = arith.divf %234, %235 : vector<8x128xf32>
    %237 = arith.mulf %228, %205 : vector<8x128xf32>
    %238 = arith.mulf %222, %230 : vector<8x128xf32>
    %239 = arith.addf %237, %238 : vector<8x128xf32>
    %240 = math.tanh %239 : vector<8x128xf32>
    %241 = arith.mulf %236, %240 : vector<8x128xf32>
    %c2_84 = arith.constant 2 : index
    %c0_85 = arith.constant 0 : index
    %c0_86 = arith.constant 0 : index
    %242 = vector.load %arg1[%c2_84, %c0_85, %c0_86] : memref<4x8x128xf32, #tpu.memory_space<vmem>>, vector<1x8x128xf32>
    %243 = vector.shape_cast %242 : vector<1x8x128xf32> to vector<8x128xf32>
    %c0_87 = arith.constant 0 : index
    %c0_88 = arith.constant 0 : index
    %244 = vector.load %arg5[%c0_87, %c0_88] : memref<128x512xf32, #tpu.memory_space<vmem>>, vector<128x512xf32>
    %cst_89 = arith.constant dense<0.000000e+00> : vector<8x512xf32>
    %245 = tpu.matmul %243, %244, %cst_89 {dimension_numbers = #tpu.dot_dimension_numbers<[1], [0], [0], [1], [0, 0, 1, 1], [], []>} : vector<8x128xf32>, vector<128x512xf32>, vector<8x512xf32> -> vector<8x512xf32>
    %c0_90 = arith.constant 0 : index
    %c0_91 = arith.constant 0 : index
    %246 = vector.load %arg6[%c0_90, %c0_91] : memref<128x512xf32, #tpu.memory_space<vmem>>, vector<128x512xf32>
    %cst_92 = arith.constant dense<0.000000e+00> : vector<8x512xf32>
    %247 = tpu.matmul %241, %246, %cst_92 {dimension_numbers = #tpu.dot_dimension_numbers<[1], [0], [0], [1], [0, 0, 1, 1], [], []>} : vector<8x128xf32>, vector<128x512xf32>, vector<8x512xf32> -> vector<8x512xf32>
    %248 = arith.addf %245, %247 : vector<8x512xf32>
    %249 = vector.broadcast %1 : vector<1x512xf32> to vector<8x512xf32>
    %250 = arith.addf %248, %249 : vector<8x512xf32>
    %251 = vector.extract_strided_slice %250 {offsets = [0, 0], sizes = [8, 128], strides = [1, 1]} : vector<8x512xf32> to vector<8x128xf32>
    %252 = arith.negf %251 : vector<8x128xf32>
    %253 = math.exp %252 : vector<8x128xf32>
    %cst_93 = arith.constant 1.000000e+00 : f32
    %254 = vector.broadcast %cst_93 : f32 to vector<8x128xf32>
    %255 = arith.addf %254, %253 : vector<8x128xf32>
    %256 = arith.divf %254, %255 : vector<8x128xf32>
    %257 = vector.extract_strided_slice %250 {offsets = [0, 128], sizes = [8, 128], strides = [1, 1]} : vector<8x512xf32> to vector<8x128xf32>
    %258 = arith.negf %257 : vector<8x128xf32>
    %259 = math.exp %258 : vector<8x128xf32>
    %cst_94 = arith.constant 1.000000e+00 : f32
    %260 = vector.broadcast %cst_94 : f32 to vector<8x128xf32>
    %261 = arith.addf %260, %259 : vector<8x128xf32>
    %262 = arith.divf %260, %261 : vector<8x128xf32>
    %263 = vector.extract_strided_slice %250 {offsets = [0, 256], sizes = [8, 128], strides = [1, 1]} : vector<8x512xf32> to vector<8x128xf32>
    %264 = math.tanh %263 : vector<8x128xf32>
    %265 = vector.extract_strided_slice %250 {offsets = [0, 384], sizes = [8, 128], strides = [1, 1]} : vector<8x512xf32> to vector<8x128xf32>
    %266 = arith.negf %265 : vector<8x128xf32>
    %267 = math.exp %266 : vector<8x128xf32>
    %cst_95 = arith.constant 1.000000e+00 : f32
    %268 = vector.broadcast %cst_95 : f32 to vector<8x128xf32>
    %269 = arith.addf %268, %267 : vector<8x128xf32>
    %270 = arith.divf %268, %269 : vector<8x128xf32>
    %271 = arith.mulf %262, %239 : vector<8x128xf32>
    %272 = arith.mulf %256, %264 : vector<8x128xf32>
    %273 = arith.addf %271, %272 : vector<8x128xf32>
    %274 = math.tanh %273 : vector<8x128xf32>
    %275 = arith.mulf %270, %274 : vector<8x128xf32>
    %c3_96 = arith.constant 3 : index
    %c0_97 = arith.constant 0 : index
    %c0_98 = arith.constant 0 : index
    %276 = vector.load %arg1[%c3_96, %c0_97, %c0_98] : memref<4x8x128xf32, #tpu.memory_space<vmem>>, vector<1x8x128xf32>
    %277 = vector.shape_cast %276 : vector<1x8x128xf32> to vector<8x128xf32>
    %c0_99 = arith.constant 0 : index
    %c0_100 = arith.constant 0 : index
    %278 = vector.load %arg5[%c0_99, %c0_100] : memref<128x512xf32, #tpu.memory_space<vmem>>, vector<128x512xf32>
    %cst_101 = arith.constant dense<0.000000e+00> : vector<8x512xf32>
    %279 = tpu.matmul %277, %278, %cst_101 {dimension_numbers = #tpu.dot_dimension_numbers<[1], [0], [0], [1], [0, 0, 1, 1], [], []>} : vector<8x128xf32>, vector<128x512xf32>, vector<8x512xf32> -> vector<8x512xf32>
    %c0_102 = arith.constant 0 : index
    %c0_103 = arith.constant 0 : index
    %280 = vector.load %arg6[%c0_102, %c0_103] : memref<128x512xf32, #tpu.memory_space<vmem>>, vector<128x512xf32>
    %cst_104 = arith.constant dense<0.000000e+00> : vector<8x512xf32>
    %281 = tpu.matmul %275, %280, %cst_104 {dimension_numbers = #tpu.dot_dimension_numbers<[1], [0], [0], [1], [0, 0, 1, 1], [], []>} : vector<8x128xf32>, vector<128x512xf32>, vector<8x512xf32> -> vector<8x512xf32>
    %282 = arith.addf %279, %281 : vector<8x512xf32>
    %283 = vector.broadcast %1 : vector<1x512xf32> to vector<8x512xf32>
    %284 = arith.addf %282, %283 : vector<8x512xf32>
    %285 = vector.extract_strided_slice %284 {offsets = [0, 0], sizes = [8, 128], strides = [1, 1]} : vector<8x512xf32> to vector<8x128xf32>
    %286 = arith.negf %285 : vector<8x128xf32>
    %287 = math.exp %286 : vector<8x128xf32>
    %cst_105 = arith.constant 1.000000e+00 : f32
    %288 = vector.broadcast %cst_105 : f32 to vector<8x128xf32>
    %289 = arith.addf %288, %287 : vector<8x128xf32>
    %290 = arith.divf %288, %289 : vector<8x128xf32>
    %291 = vector.extract_strided_slice %284 {offsets = [0, 128], sizes = [8, 128], strides = [1, 1]} : vector<8x512xf32> to vector<8x128xf32>
    %292 = arith.negf %291 : vector<8x128xf32>
    %293 = math.exp %292 : vector<8x128xf32>
    %cst_106 = arith.constant 1.000000e+00 : f32
    %294 = vector.broadcast %cst_106 : f32 to vector<8x128xf32>
    %295 = arith.addf %294, %293 : vector<8x128xf32>
    %296 = arith.divf %294, %295 : vector<8x128xf32>
    %297 = vector.extract_strided_slice %284 {offsets = [0, 256], sizes = [8, 128], strides = [1, 1]} : vector<8x512xf32> to vector<8x128xf32>
    %298 = math.tanh %297 : vector<8x128xf32>
    %299 = vector.extract_strided_slice %284 {offsets = [0, 384], sizes = [8, 128], strides = [1, 1]} : vector<8x512xf32> to vector<8x128xf32>
    %300 = arith.negf %299 : vector<8x128xf32>
    %301 = math.exp %300 : vector<8x128xf32>
    %cst_107 = arith.constant 1.000000e+00 : f32
    %302 = vector.broadcast %cst_107 : f32 to vector<8x128xf32>
    %303 = arith.addf %302, %301 : vector<8x128xf32>
    %304 = arith.divf %302, %303 : vector<8x128xf32>
    %305 = arith.mulf %296, %273 : vector<8x128xf32>
    %306 = arith.mulf %290, %298 : vector<8x128xf32>
    %307 = arith.addf %305, %306 : vector<8x128xf32>
    %308 = math.tanh %307 : vector<8x128xf32>
    %309 = arith.mulf %304, %308 : vector<8x128xf32>
    %310 = tpu.concatenate %207, %241, %275, %309 in 1 : vector<8x128xf32>, vector<8x128xf32>, vector<8x128xf32>, vector<8x128xf32> -> vector<8x512xf32>
    %c0_108 = arith.constant 0 : index
    %c0_109 = arith.constant 0 : index
    %311 = vector.load %arg8[%c0_108, %c0_109] : memref<512x32xf32, #tpu.memory_space<vmem>>, vector<512x32xf32>
    %cst_110 = arith.constant dense<0.000000e+00> : vector<8x32xf32>
    %312 = tpu.matmul %310, %311, %cst_110 {dimension_numbers = #tpu.dot_dimension_numbers<[1], [0], [0], [1], [0, 0, 1, 1], [], []>} : vector<8x512xf32>, vector<512x32xf32>, vector<8x32xf32> -> vector<8x32xf32>
    %c0_111 = arith.constant 0 : index
    %c0_112 = arith.constant 0 : index
    %313 = vector.load %arg9[%c0_111, %c0_112] : memref<1x32xf32, #tpu.memory_space<vmem>>, vector<1x32xf32>
    %314 = vector.broadcast %313 : vector<1x32xf32> to vector<8x32xf32>
    %315 = arith.addf %312, %314 : vector<8x32xf32>
    %c0_113 = arith.constant 0 : index
    %c0_114 = arith.constant 0 : index
    %316 = vector.load %arg10[%c0_113, %c0_114] : memref<8x32xf32, #tpu.memory_space<vmem>>, vector<8x32xf32>
    tpu.vector_store %arg10[%c0_113, %c0_114], %315 {strides = array<i32>} : memref<8x32xf32, #tpu.memory_space<vmem>>, vector<8x32xf32>,
    return
  }
}

</mosaic_0001>

<bundles_post_ra>
// kernel: tpu_custom_call.1
= control target key start
LH: loop header
LB: loop body
LE: loop exit
PB: predicated region body
PF: predicated region fallthrough
CT: control target
= control target key end

     0   :  { %15 = vsyncpa [#allocation3], 0  ;;  %s5976_s0 = inlined_call_operand.vmem [shape: f32[5,8,8], index: 0, kind: input, shape index: {}]   ;;  %s5977_s1 = inlined_call_operand.vmem [shape: f32[4,8,128], index: 1, kind: input, shape index: {}]   ;;  %s5978_s2 = inlined_call_operand.vmem [shape: f32[8,512], index: 2, kind: input, shape index: {}]   ;;  %s5979_s3 = inlined_call_operand.vmem [shape: f32[128,512], index: 3, kind: input, shape index: {}]   ;;  %s5980_s4 = inlined_call_operand.vmem [shape: f32[1,512], index: 4, kind: input, shape index: {}]   ;;  %s5981_s5 = inlined_call_operand.hbm [shape: f32[128,512], index: 5, kind: input, shape index: {}]   ;;  %s5982_s6 = inlined_call_operand.hbm [shape: f32[128,512], index: 6, kind: input, shape index: {}]   ;;  %s5983_s7 = inlined_call_operand.vmem [shape: f32[1,512], index: 7, kind: input, shape index: {}]   ;;  %s5984_s8 = inlined_call_operand.vmem [shape: f32[512,32], index: 8, kind: input, shape index: {}]   ;;  %s5985_s9 = inlined_call_operand.vmem [shape: f32[1,32], index: 9, kind: input, shape index: {}]   ;;  %s5986_s10 = inlined_call_operand.hbm [shape: f32[8,32], index: 10, kind: output, shape index: {}]  }
   0x1   :  { %16 = vsyncpa [#allocation6], 0 }
   0x2   :  { %17 = vsyncpa [#allocation4], 0  ;;  %s4642_s13 = smov [#allocation2]   ;;  %s4570_s17 = scalar_lea.hbm %s5981_s5, 8192 }
   0x3   :  { %s33_s14 = sshll.u32 %s4642_s13, 4  ;;  %p4571_p0 = scmp.ne.s32.totalorder %s5981_s5, %s4570_s17  ;;  %s34_s14 = int_to_ptr.vmem [resolvable:$true] %s33_s14 }
   0x4   :  { %p4574_p1 = scmp.lt.u32.totalorder %s4570_s17, %s5981_s5 }
   0x6   :  { %p4576_p2 = pnand %p4574_p1, %p4571_p0 }
   0x8   :  { %4579 = shalt.err (!%p4576_p2)
}
   0x9   :  { %s4580_s22 = scalar_lea.vmem %s34_s14, 8192  ;;  %p4585_p4 = scmp.lt.s32.totalorder %s34_s14, %s34_s14 }
   0xa   :  { %p4581_p3 = scmp.ne.s32.totalorder %s34_s14, %s4580_s22  ;;  %p4586_p5 = scmp.lt.s32.totalorder %s4580_s22, %s4580_s22 }
   0xc   :  { %p4587_p6 = por %p4586_p5, %p4585_p4 }
   0xe   :  { %p4588_p7 = pnand %p4587_p6, %p4581_p3 }
  0x10   :  { %4591 = shalt.err (!%p4588_p7)
}
  0x11   :  { %s4643_s23 = smov 512   ;;  %s4644_s24 = smov 32  }
  0x12   :  { %39 = dma.hbm_to_vmem [thread:$0]  %s5981_s5, 8192, %s34_s14, [#allocation3], %s4643_s23, %s4643_s23, %s4644_s24  }
  0x13   :  { %s4645_s27 = smov [#allocation5]   ;;  %s4592_s11 = scalar_lea.hbm %s5982_s6, 8192 }
  0x14   :  { %s45_s28 = sshll.u32 %s4645_s27, 4  ;;  %p4593_p8 = scmp.ne.s32.totalorder %s5982_s6, %s4592_s11  ;;  %s46_s28 = int_to_ptr.vmem [resolvable:$true] %s45_s28 }
  0x15   :  { %p4596_p9 = scmp.lt.u32.totalorder %s4592_s11, %s5982_s6 }
  0x17   :  { %p4598_p10 = pnand %p4596_p9, %p4593_p8 }
  0x19   :  { %4601 = shalt.err (!%p4598_p10)
}
  0x1a   :  { %s4602_s17 = scalar_lea.vmem %s46_s28, 8192  ;;  %p4607_p12 = scmp.lt.s32.totalorder %s46_s28, %s46_s28 }
  0x1b   :  { %p4603_p11 = scmp.ne.s32.totalorder %s46_s28, %s4602_s17  ;;  %p4608_p13 = scmp.lt.s32.totalorder %s4602_s17, %s4602_s17 }
  0x1d   :  { %p4609_p0 = por %p4608_p13, %p4607_p12 }
  0x1f   :  { %p4610_p1 = pnand %p4609_p0, %p4603_p11 }
  0x21   :  { %4613 = shalt.err (!%p4610_p1)
}
  0x22   :  { %51 = dma.hbm_to_vmem [thread:$0]  %s5982_s6, 8192, %s46_s28, [#allocation6], %s4643_s23, %s4643_s23, %s4644_s24  }
  0x23   :  { %4636 = dma.done.wait [#allocation3], 8192  }
  0x24   :  { %4637 = vsyncadd [#allocation3], 4294959104 }
  0x25   :  { %4638 = dma.done.wait [#allocation6], 8192  }
  0x26   :  { %4639 = vsyncadd [#allocation6], 4294959104  ;;  %v5991_v0 = vmov 0.0   ;;  %v72_v1 = vld [vmem:[%s5979_s3 + $0x8] sm:$0xff]  ;;  %v71_v3 = vld [vmem:[%s5979_s3] sm:$0xff]  ;;  %vm277_vm0 = vcmask 64512  }
  0x27   :  { %199 = vmatprep.mubr.f32.mxu0 %v5991_v0  ;;  %270 = vmatprep.mubr.f32.mxu1 %v5991_v0  ;;  %v76_v2 = vld [vmem:[%s5979_s3 + $0x28] sm:$0xff]  ;;  %v75_v5 = vld [vmem:[%s5979_s3 + $0x20] sm:$0xff]  ;;  %v74_v12 = vld [vmem:[%s5979_s3 + $0x18] sm:$0xff]  ;;  %vm3355_vm1 = vcmask 261120  }
  0x28   :  { %v4738_v4 = vpack.c.bf16 %v76_v2, %v72_v1  ;;  %v80_v6 = vld [vmem:[%s5979_s3 + $0x48] sm:$0xff]  ;;  %v4749_v8 = vpack.c.bf16 %v75_v5, %v71_v3  ;;  %v79_v10 = vld [vmem:[%s5979_s3 + $0x40] sm:$0xff]  ;;  %v78_v13 = vld [vmem:[%s5979_s3 + $0x38] sm:$0xff] }
  0x29   :  { %v84_v7 = vld [vmem:[%s5979_s3 + $0x68] sm:$0xff]  ;;  %v83_v11 = vld [vmem:[%s5979_s3 + $0x60] sm:$0xff]  ;;  %v4775_v17 = vpack.c.bf16 %v78_v13, %v74_v12  ;;  %v73_v18 = vld [vmem:[%s5979_s3 + $0x10] sm:$0xff] }
  0x2a   :  { %v4751_v9 = vpack.c.bf16 %v84_v7, %v80_v6  ;;  %3489 = vmatprep.subr.bf16.mxu0 %v4738_v4  ;;  %v88_v14 = vld [vmem:[%s5979_s3 + $0x88] sm:$0xff]  ;;  %v4773_v16 = vpack.c.bf16 %v83_v11, %v79_v10  ;;  %v77_v19 = vld [vmem:[%s5979_s3 + $0x30] sm:$0xff]  ;;  %v87_v20 = vld [vmem:[%s5979_s3 + $0x80] sm:$0xff] }
  0x2b   :  { %v92_v15 = vld [vmem:[%s5979_s3 + $0xa8] sm:$0xff]  ;;  %3491 = vmatpush1.bf16.msra.mxu0 %v4749_v8  ;;  %v4789_v22 = vpack.c.bf16 %v77_v19, %v73_v18  ;;  %v91_v23 = vld [vmem:[%s5979_s3 + $0xa0] sm:$0xff]  ;;  %v82_v24 = vld [vmem:[%s5979_s3 + $0x58] sm:$0xff]  ;;  %3521 = vmatprep.subr.bf16.mxu1 %v4775_v17 }
  0x2c   :  { %3493 = vmatprep.subr.bf16.mxu0 %v4751_v9  ;;  %v4787_v21 = vpack.c.bf16 %v92_v15, %v88_v14  ;;  %v86_v25 = vld [vmem:[%s5979_s3 + $0x78] sm:$0xff]  ;;  %v96_v27 = vld [vmem:[%s5979_s3 + $0xc8] sm:$0xff]  ;;  %v81_v29 = vld [vmem:[%s5979_s3 + $0x50] sm:$0xff]  ;;  %v4817_v31 = vpack.c.bf16 %v91_v23, %v87_v20 }
  0x2d   :  { %v4801_v26 = vpack.c.bf16 %v86_v25, %v82_v24  ;;  %v100_v28 = vld [vmem:[%s5979_s3 + $0xe8] sm:$0xff]  ;;  %3523 = vmatpush1.bf16.msra.mxu1 %v4789_v22  ;;  %v85_v30 = vld [vmem:[%s5979_s3 + $0x70] sm:$0xff]  ;;  %v95_v33 = vld [vmem:[%s5979_s3 + $0xc0] sm:$0xff] }
  0x2e   :  { %v4820_v32 = vpack.c.bf16 %v85_v30, %v81_v29  ;;  %v90_v34 = vld [vmem:[%s5979_s3 + $0x98] sm:$0xff]  ;;  %v4832_v36 = vpack.c.bf16 %v100_v28, %v96_v27  ;;  %v99_v37 = vld [vmem:[%s5979_s3 + $0xe0] sm:$0xff]  ;;  %v89_v39 = vld [vmem:[%s5979_s3 + $0x90] sm:$0xff] }
  0x2f   :  { %3495 = vmatpush1.bf16.msra.mxu0 %v4773_v16  ;;  %3525 = vmatprep.subr.bf16.mxu1 %v4801_v26  ;;  %v94_v35 = vld [vmem:[%s5979_s3 + $0xb8] sm:$0xff]  ;;  %v93_v40 = vld [vmem:[%s5979_s3 + $0xb0] sm:$0xff]  ;;  %v104_v41 = vld [vmem:[%s5979_s3 + $0x108] sm:$0xff]  ;;  %v4861_v46 = vpack.c.bf16 %v99_v37, %v95_v33 }
  0x30   :  { %3497 = vmatprep.subr.bf16.mxu0 %v4787_v21  ;;  %v4837_v38 = vpack.c.bf16 %v94_v35, %v90_v34  ;;  %v108_v42 = vld [vmem:[%s5979_s3 + $0x128] sm:$0xff]  ;;  %v98_v43 = vld [vmem:[%s5979_s3 + $0xd8] sm:$0xff]  ;;  %v4855_v44 = vpack.c.bf16 %v93_v40, %v89_v39  ;;  %v103_v47 = vld [vmem:[%s5979_s3 + $0x100] sm:$0xff] }
  0x31   :  { %3527 = vmatpush1.bf16.msra.mxu1 %v4820_v32  ;;  %v102_v45 = vld [vmem:[%s5979_s3 + $0xf8] sm:$0xff]  ;;  %v97_v49 = vld [vmem:[%s5979_s3 + $0xd0] sm:$0xff]  ;;  %v4876_v51 = vpack.c.bf16 %v108_v42, %v104_v41  ;;  %v107_v52 = vld [vmem:[%s5979_s3 + $0x120] sm:$0xff] }
  0x32   :  { %3529 = vmatprep.subr.bf16.mxu1 %v4837_v38  ;;  %v4867_v48 = vpack.c.bf16 %v102_v45, %v98_v43  ;;  %v101_v50 = vld [vmem:[%s5979_s3 + $0xf0] sm:$0xff]  ;;  %v106_v53 = vld [vmem:[%s5979_s3 + $0x118] sm:$0xff]  ;;  %v112_v55 = vld [vmem:[%s5979_s3 + $0x148] sm:$0xff]  ;;  %v4897_v58 = vpack.c.bf16 %v107_v52, %v103_v47 }
  0x33   :  { %3499 = vmatpush1.bf16.msra.mxu0 %v4817_v31  ;;  %v110_v54 = vld [vmem:[%s5979_s3 + $0x138] sm:$0xff]  ;;  %v116_v56 = vld [vmem:[%s5979_s3 + $0x168] sm:$0xff]  ;;  %v4894_v57 = vpack.c.bf16 %v101_v50, %v97_v49  ;;  %v111_v59 = vld [vmem:[%s5979_s3 + $0x140] sm:$0xff] }
  0x34   :  { %3501 = vmatprep.subr.bf16.mxu0 %v4832_v36  ;;  %v4903_v60 = vpack.c.bf16 %v110_v54, %v106_v53  ;;  %v105_v61 = vld [vmem:[%s5979_s3 + $0x110] sm:$0xff]  ;;  %v4912_v63 = vpack.c.bf16 %v116_v56, %v112_v55  ;;  %v115_v1 = vld [vmem:[%s5979_s3 + $0x160] sm:$0xff]  ;;  %v114_v2 = vld [vmem:[%s5979_s3 + $0x158] sm:$0xff]  ;;  %v424_v55 = vlaneseq }
  0x35   :  { %3531 = vmatpush1.bf16.msra.mxu1 %v4855_v44  ;;  %v109_v62 = vld [vmem:[%s5979_s3 + $0x130] sm:$0xff]  ;;  %v118_v3 = vld [vmem:[%s5979_s3 + $0x178] sm:$0xff]  ;;  %v120_v5 = vld [vmem:[%s5979_s3 + $0x188] sm:$0xff]  ;;  %v4933_v10 = vpack.c.bf16 %v115_v1, %v111_v59 }
  0x36   :  { %3533 = vmatprep.subr.bf16.mxu1 %v4867_v48  ;;  %v124_v6 = vld [vmem:[%s5979_s3 + $0x1a8] sm:$0xff]  ;;  %v4930_v7 = vpack.c.bf16 %v109_v62, %v105_v61  ;;  %v119_v11 = vld [vmem:[%s5979_s3 + $0x180] sm:$0xff]  ;;  %v4939_v12 = vpack.c.bf16 %v118_v3, %v114_v2  ;;  %v113_v13 = vld [vmem:[%s5979_s3 + $0x150] sm:$0xff]  ;;  %v5086_v56 = vshrl.u32 %v424_v55, 7 }
  0x37   :  { %3503 = vmatpush1.bf16.msra.mxu0 %v4861_v46  ;;  %v117_v14 = vld [vmem:[%s5979_s3 + $0x170] sm:$0xff]  ;;  %v4948_v15 = vpack.c.bf16 %v124_v6, %v120_v5  ;;  %v123_v18 = vld [vmem:[%s5979_s3 + $0x1a0] sm:$0xff]  ;;  %v122_v19 = vld [vmem:[%s5979_s3 + $0x198] sm:$0xff] }
  0x38   :  { %3505 = vmatprep.subr.bf16.mxu0 %v4876_v51  ;;  %v126_v20 = vld [vmem:[%s5979_s3 + $0x1b8] sm:$0xff]  ;;  %v128_v23 = vld [vmem:[%s5979_s3 + $0x1c8] sm:$0xff]  ;;  %v4966_v25 = vpack.c.bf16 %v117_v14, %v113_v13  ;;  %v4969_v27 = vpack.c.bf16 %v123_v18, %v119_v11  ;;  %v127_v28 = vld [vmem:[%s5979_s3 + $0x1c0] sm:$0xff]  ;;  %v5990_v59 = vsub.s32 0, %v5086_v56  ;;  %v5989_v62 = vsub.s32 1, %v5086_v56 }
  0x39   :  { %3535 = vmatpush1.bf16.msra.mxu1 %v4894_v57  ;;  %v132_v24 = vld [vmem:[%s5979_s3 + $0x1e8] sm:$0xff]  ;;  %v4975_v29 = vpack.c.bf16 %v126_v20, %v122_v19  ;;  %v121_v30 = vld [vmem:[%s5979_s3 + $0x190] sm:$0xff]  ;;  %v131_v35 = vld [vmem:[%s5979_s3 + $0x1e0] sm:$0xff]  ;;  %v5988_v5 = vsub.s32 3, %v5086_v56 }
  0x3a   :  { %3537 = vmatprep.subr.bf16.mxu1 %v4903_v60  ;;  %v125_v33 = vld [vmem:[%s5979_s3 + $0x1b0] sm:$0xff]  ;;  %v4984_v34 = vpack.c.bf16 %v132_v24, %v128_v23  ;;  %v130_v37 = vld [vmem:[%s5979_s3 + $0x1d8] sm:$0xff]  ;;  %v4999_v41 = vpack.c.bf16 %v131_v35, %v127_v28  ;;  %v5014_v47 = vld [vmem:[%s5978_s2 + $0x8] sm:$0xff]  ;;  %v5987_v24 = vsub.s32 2, %v5086_v56 }
  0x3b   :  { %3507 = vmatpush1.bf16.msra.mxu0 %v4897_v58  ;;  %v134_v39 = vld [vmem:[%s5979_s3 + $0x1f8] sm:$0xff]  ;;  %v4996_v40 = vpack.c.bf16 %v125_v33, %v121_v30  ;;  %v129_v43 = vld [vmem:[%s5979_s3 + $0x1d0] sm:$0xff]  ;;  %v5025_v50 = vld [vmem:[%s5978_s2] sm:$0xff] }
  0x3c   :  { %3509 = vmatprep.subr.bf16.mxu0 %v4912_v63  ;;  %v5002_v42 = vpack.c.bf16 %v134_v39, %v130_v37  ;;  %v133_v45 = vld [vmem:[%s5979_s3 + $0x1f0] sm:$0xff]  ;;  %v5030_v52 = vld [vmem:[%s5978_s2 + $0x18] sm:$0xff]  ;;  %v66_v54 = vld [vmem:[%s5976_s0] sm:$0xff] }
  0x3d   :  { %3539 = vmatpush1.bf16.msra.mxu1 %v4930_v7  ;;  %v5017_v49 = vpack.c.bf16 %v133_v45, %v129_v43  ;;  %v5039_v53 = vld [vmem:[%s5978_s2 + $0x10] sm:$0xff]  ;;  %v64_v61 = vld [vmem:[%s5980_s4] sm:$0xf] }
  0x3e   :  { %3541 = vmatprep.subr.bf16.mxu1 %v4939_v12  ;;  %v5095_v1 = vrot.slane %v64_v61, %v5990_v59  ;;  %v5099_v2 = vrot.slane %v64_v61, %v5989_v62  ;;  %v5106_v23 = vrot.slane %v64_v61, %v5988_v5  ;;  %v5112_v30 = vrot.slane %v64_v61, %v5987_v24  ;;  %v1772_v24 = vld [vmem:[#allocation2 + $0xf8] sm:$0xff]  ;;  %v1774_v5 = vld [vmem:[#allocation2 + $0x108] sm:$0xff] }
  0x3f   :  { %3511 = vmatpush1.bf16.msra.mxu0 %v4933_v10  ;;  %v1778_v62 = vld [vmem:[#allocation2 + $0x128] sm:$0xff]  ;;  %v1776_v59 = vld [vmem:[#allocation2 + $0x118] sm:$0xff] }
  0x40   :  { %3513 = vmatprep.subr.bf16.mxu0 %v4948_v15 }
  0x41   :  { %3543 = vmatpush1.bf16.msra.mxu1 %v4966_v25 }
  0x42   :  { %3545 = vmatprep.subr.bf16.mxu1 %v4975_v29 }
  0x43   :  { %3515 = vmatpush1.bf16.msra.mxu0 %v4969_v27 }
  0x44   :  { %3517 = vmatprep.subr.bf16.mxu0 %v4984_v34 }
  0x45   :  { %3547 = vmatpush1.bf16.msra.mxu1 %v4996_v40 }
  0x46   :  { %3549 = vmatprep.subr.bf16.mxu1 %v5002_v42 }
  0x47   :  { %3519 = vmatpush1.bf16.msra.mxu0 %v4999_v41 }
  0x48   :  { %281 = vmatprep.subr.mxu0 %v5014_v47 }
  0x49   :  { %3551 = vmatpush1.bf16.msra.mxu1 %v5017_v49 }
  0x4a   :  { %200 = vmatmul.mubr.f32.vlgmr.msra.gmra.mrb[0].mxu0 %v5991_v0  ;;  %352 = vmatprep.subr.mxu1 %v5030_v52 }
  0x4b   :  { %282 = vmatpush1.msra.mxu0 %v5025_v50  ;;  %345 = vmatprep.mubr.f32.mxu0 %v5991_v0 }
  0x4c   :  { %3553 = vmatprep.subr.bf16.mxu0 %v4738_v4  ;;  %271 = vmatmul.mubr.f32.vlgmr.msra.gmra.mrb[0].mxu1 %v5991_v0 }
  0x4d   :  { %353 = vmatpush1.msra.mxu1 %v5039_v53  ;;  %416 = vmatprep.mubr.f32.mxu1 %v5991_v0 }
  0x4e   :  { %3585 = vmatprep.subr.bf16.mxu1 %v4775_v17 }
  0x52   :  { %3373 = vmatmul.mubr.msk.f32.vlgmr.msra.gmra.mrb[0].mxu0 %vm277_vm0, %v66_v54 }
  0x53   :  { %3555 = vmatpush1.bf16.msra.mxu0 %v4749_v8  ;;  %538 = vmatprep.mubr.f32.mxu0 %v5991_v0 }
  0x54   :  { %3557 = vmatprep.subr.bf16.mxu0 %v4751_v9  ;;  %3374 = vmatmul.mubr.msk.f32.vlgmr.msra.gmra.mrb[0].mxu1 %vm277_vm0, %v66_v54 }
  0x55   :  { %3587 = vmatpush1.bf16.msra.mxu1 %v4789_v22  ;;  %609 = vmatprep.mubr.f32.mxu1 %v5991_v0 }
  0x56   :  { %3589 = vmatprep.subr.bf16.mxu1 %v4801_v26 }
  0x57   :  { %3559 = vmatpush1.bf16.msra.mxu0 %v4773_v16 }
  0x58   :  { %3561 = vmatprep.subr.bf16.mxu0 %v4787_v21 }
  0x59   :  { %3591 = vmatpush1.bf16.msra.mxu1 %v4820_v32 }
  0x5a   :  { %3593 = vmatprep.subr.bf16.mxu1 %v4837_v38 }
  0x5b   :  { %3563 = vmatpush1.bf16.msra.mxu0 %v4817_v31 }
  0x5c   :  { %3565 = vmatprep.subr.bf16.mxu0 %v4832_v36 }
  0x5d   :  { %3595 = vmatpush1.bf16.msra.mxu1 %v4855_v44 }
  0x5e   :  { %3597 = vmatprep.subr.bf16.mxu1 %v4867_v48 }
  0x5f   :  { %3567 = vmatpush1.bf16.msra.mxu0 %v4861_v46 }
  0x60   :  { %3569 = vmatprep.subr.bf16.mxu0 %v4876_v51 }
  0x61   :  { %3599 = vmatpush1.bf16.msra.mxu1 %v4894_v57 }
  0x62   :  { %3601 = vmatprep.subr.bf16.mxu1 %v4903_v60 }
  0x63   :  { %3571 = vmatpush1.bf16.msra.mxu0 %v4897_v58 }
  0x64   :  { %3573 = vmatprep.subr.bf16.mxu0 %v4912_v63 }
  0x65   :  { %3603 = vmatpush1.bf16.msra.mxu1 %v4930_v7 }
  0x66   :  { %3605 = vmatprep.subr.bf16.mxu1 %v4939_v12 }
  0x67   :  { %3575 = vmatpush1.bf16.msra.mxu0 %v4933_v10 }
  0x68   :  { %3577 = vmatprep.subr.bf16.mxu0 %v4948_v15 }
  0x69   :  { %3607 = vmatpush1.bf16.msra.mxu1 %v4966_v25 }
  0x6a   :  { %3609 = vmatprep.subr.bf16.mxu1 %v4975_v29 }
  0x6b   :  { %3579 = vmatpush1.bf16.msra.mxu0 %v4969_v27 }
  0x6c   :  { %3581 = vmatprep.subr.bf16.mxu0 %v4984_v34 }
  0x6d   :  { %3611 = vmatpush1.bf16.msra.mxu1 %v4996_v40 }
  0x6e   :  { %3613 = vmatprep.subr.bf16.mxu1 %v5002_v42 }
  0x6f   :  { %3583 = vmatpush1.bf16.msra.mxu0 %v4999_v41 }
  0x70   :  { %619 = vmatprep.subr.mxu0 %v5014_v47 }
  0x71   :  { %3615 = vmatpush1.bf16.msra.mxu1 %v5017_v49 }
  0x72   :  { %690 = vmatprep.subr.mxu1 %v5030_v52 }
 0x125   :  { %v347_v3 = vpop.f32.mrb[0].mxu0 }
 0x126   :  { %v444_v6 = vadd.f32 %v5095_v1, %v347_v3  ;;  %v349_v11 = vpop.f32.mrb[1].mxu0 }
 0x127   :  { %v445_v13 = vadd.f32 %v5099_v2, %v349_v11  ;;  %v418_v18 = vpop.f32.mrb[0].mxu1 }
 0x128   :  { %v3375_v14 = vmul.f32 -1.442695, %v444_v6  ;;  %v420_v20 = vpop.f32.mrb[1].mxu1  ;;  %v446_v35 = vadd.f32 %v5112_v30, %v418_v18 }
 0x129   :  { %v3376_v19 = vmul.f32 -1.442695, %v445_v13  ;;  %v447_v28 = vadd.f32 %v5106_v23, %v420_v20 }
 0x12a   :  { %4426 = vpow2.f32 %v3375_v14 }
 0x12b   :  { %4428 = vpow2.f32 %v3376_v19  ;;  %v3377_v33 = vmul.f32 -1.442695, %v447_v28  ;;  %v3378_v28 = vld [vmem:[%s5976_s0 + $0x8] sm:$0xff] }
 0x12d   :  { %4430 = vpow2.f32 %v3377_v33 }
 0x12e   :  { %4432 = vtanh.f32 %v446_v35 }
 0x134   :  { %v4427_v37 = vpop.eup %4426 }
 0x135   :  { %v4429_v39 = vpop.eup %4428  ;;  %v451_v43 = vadd.f32 1.0, %v4427_v37 }
 0x136   :  { %v457_v45 = vadd.f32 1.0, %v4429_v39 }
 0x137   :  { %4434 = vrcp.f32 %v451_v43  ;;  %v4431_v54 = vpop.eup %4430 }
 0x138   :  { %4436 = vrcp.f32 %v457_v45  ;;  %v4433_v55 = vpop.eup %4432  ;;  %v464_v13 = vadd.f32 1.0, %v4431_v54 }
 0x13a   :  { %4438 = vrcp.f32 %v464_v13 }
 0x141   :  { %v4435_v3 = vpop.eup %4434 }
 0x142   :  { %v4437_v6 = vpop.eup %4436  ;;  %v468_v11 = vmul.f32 %v4435_v3, %v4433_v55 }
 0x143   :  { %v467_v14 = vmul.f32 0.0, %v4437_v6 }
 0x144   :  { %v4439_v18 = vpop.eup %4438 }
 0x145   :  { %v5115_v61 = vadd.f32 %v468_v11, %v467_v14 }
 0x147   :  { %4440 = vtanh.f32 %v5115_v61 }
 0x151   :  { %v4441_v19 = vpop.eup %4440 }
 0x152   :  { %v471_v20 = vmul.f32 %v4441_v19, %v4439_v18 }
 0x154   :  { %539 = vmatmul.mubr.f32.vlgmr.msra.gmra.mrb[2].mxu0 %v471_v20  ;;  %610 = vmatmul.mubr.f32.vlgmr.msra.gmra.mrb[2].mxu1 %v471_v20 }
 0x155   :  { %620 = vmatpush1.msra.mxu0 %v5025_v50  ;;  %683 = vmatprep.mubr.f32.mxu0 %v5991_v0 }
 0x156   :  { %691 = vmatpush1.msra.mxu1 %v5039_v53  ;;  %754 = vmatprep.mubr.f32.mxu1 %v5991_v0 }
 0x157   :  { %3617 = vmatprep.subr.bf16.mxu0 %v4738_v4  ;;  %3649 = vmatprep.subr.bf16.mxu1 %v4775_v17 }
 0x15c   :  { %3379 = vmatmul.mubr.msk.f32.vlgmr.msra.gmra.mrb[2].mxu0 %vm277_vm0, %v3378_v28  ;;  %3380 = vmatmul.mubr.msk.f32.vlgmr.msra.gmra.mrb[2].mxu1 %vm277_vm0, %v3378_v28 }
 0x15d   :  { %3619 = vmatpush1.bf16.msra.mxu0 %v4749_v8  ;;  %3651 = vmatpush1.bf16.msra.mxu1 %v4789_v22 }
 0x15e   :  { %3621 = vmatprep.subr.bf16.mxu0 %v4751_v9  ;;  %3653 = vmatprep.subr.bf16.mxu1 %v4801_v26 }
 0x15f   :  { %855 = vmatprep.mubr.f32.mxu0 %v5991_v0  ;;  %926 = vmatprep.mubr.f32.mxu1 %v5991_v0 }
 0x161   :  { %3623 = vmatpush1.bf16.msra.mxu0 %v4773_v16  ;;  %3655 = vmatpush1.bf16.msra.mxu1 %v4820_v32 }
 0x162   :  { %3625 = vmatprep.subr.bf16.mxu0 %v4787_v21  ;;  %3657 = vmatprep.subr.bf16.mxu1 %v4837_v38 }
 0x165   :  { %3627 = vmatpush1.bf16.msra.mxu0 %v4817_v31  ;;  %3659 = vmatpush1.bf16.msra.mxu1 %v4855_v44 }
 0x166   :  { %3629 = vmatprep.subr.bf16.mxu0 %v4832_v36  ;;  %3661 = vmatprep.subr.bf16.mxu1 %v4867_v48 }
 0x169   :  { %3631 = vmatpush1.bf16.msra.mxu0 %v4861_v46  ;;  %3663 = vmatpush1.bf16.msra.mxu1 %v4894_v57 }
 0x16a   :  { %3633 = vmatprep.subr.bf16.mxu0 %v4876_v51  ;;  %3665 = vmatprep.subr.bf16.mxu1 %v4903_v60 }
 0x16d   :  { %3635 = vmatpush1.bf16.msra.mxu0 %v4897_v58  ;;  %3667 = vmatpush1.bf16.msra.mxu1 %v4930_v7 }
 0x16e   :  { %3637 = vmatprep.subr.bf16.mxu0 %v4912_v63  ;;  %3669 = vmatprep.subr.bf16.mxu1 %v4939_v12 }
 0x171   :  { %3639 = vmatpush1.bf16.msra.mxu0 %v4933_v10  ;;  %3671 = vmatpush1.bf16.msra.mxu1 %v4966_v25 }
 0x172   :  { %3641 = vmatprep.subr.bf16.mxu0 %v4948_v15  ;;  %3673 = vmatprep.subr.bf16.mxu1 %v4975_v29 }
 0x175   :  { %3643 = vmatpush1.bf16.msra.mxu0 %v4969_v27  ;;  %3675 = vmatpush1.bf16.msra.mxu1 %v4996_v40 }
 0x176   :  { %3645 = vmatprep.subr.bf16.mxu0 %v4984_v34  ;;  %3677 = vmatprep.subr.bf16.mxu1 %v5002_v42 }
 0x179   :  { %3647 = vmatpush1.bf16.msra.mxu0 %v4999_v41  ;;  %3679 = vmatpush1.bf16.msra.mxu1 %v5017_v49 }
 0x17a   :  { %936 = vmatprep.subr.mxu0 %v5014_v47  ;;  %1007 = vmatprep.subr.mxu1 %v5030_v52 }
 0x22f   :  { %v685_v33 = vpop.f32.mrb[2].mxu0  ;;  %v756_v35 = vpop.f32.mrb[2].mxu1 }
 0x230   :  { %v761_v37 = vadd.f32 %v685_v33, %v5095_v1  ;;  %v687_v39 = vpop.f32.mrb[3].mxu0  ;;  %v758_v43 = vpop.f32.mrb[3].mxu1  ;;  %v763_v11 = vadd.f32 %v756_v35, %v5112_v30 }
 0x231   :  { %v762_v45 = vadd.f32 %v687_v39, %v5099_v2  ;;  %v764_v3 = vadd.f32 %v758_v43, %v5106_v23 }
 0x232   :  { %v3381_v54 = vmul.f32 -1.442695, %v761_v37 }
 0x233   :  { %v3382_v55 = vmul.f32 -1.442695, %v762_v45  ;;  %v3383_v6 = vmul.f32 -1.442695, %v764_v3 }
 0x234   :  { %4442 = vpow2.f32 %v3381_v54 }
 0x235   :  { %4444 = vpow2.f32 %v3382_v55 }
 0x236   :  { %4446 = vpow2.f32 %v3383_v6 }
 0x237   :  { %4448 = vtanh.f32 %v763_v11 }
 0x23e   :  { %v4443_v13 = vpop.eup %4442 }
 0x23f   :  { %v4445_v14 = vpop.eup %4444  ;;  %v768_v18 = vadd.f32 1.0, %v4443_v13 }
 0x240   :  { %v774_v19 = vadd.f32 1.0, %v4445_v14  ;;  %v4447_v20 = vpop.eup %4446 }
 0x241   :  { %4450 = vrcp.f32 %v768_v18  ;;  %v4449_v28 = vpop.eup %4448  ;;  %v781_v45 = vadd.f32 1.0, %v4447_v20 }
 0x242   :  { %4452 = vrcp.f32 %v774_v19 }
 0x243   :  { %4454 = vrcp.f32 %v781_v45 }
 0x24b   :  { %v4451_v33 = vpop.eup %4450 }
 0x24c   :  { %v4453_v37 = vpop.eup %4452  ;;  %v785_v39 = vmul.f32 %v4451_v33, %v4449_v28 }
 0x24d   :  { %v784_v54 = vmul.f32 %v4453_v37, %v5115_v61  ;;  %v4455_v35 = vpop.eup %4454  ;;  %v3384_v61 = vld [vmem:[%s5976_s0 + $0x10] sm:$0xff] }
 0x24f   :  { %v5168_v43 = vadd.f32 %v785_v39, %v784_v54 }
 0x251   :  { %4456 = vtanh.f32 %v5168_v43 }
 0x25b   :  { %v4457_v55 = vpop.eup %4456 }
 0x25c   :  { %v788_v3 = vmul.f32 %v4457_v55, %v4455_v35 }
 0x25e   :  { %856 = vmatmul.mubr.f32.vlgmr.msra.gmra.mrb[4].mxu0 %v788_v3  ;;  %927 = vmatmul.mubr.f32.vlgmr.msra.gmra.mrb[4].mxu1 %v788_v3 }
 0x25f   :  { %937 = vmatpush1.msra.mxu0 %v5025_v50  ;;  %1000 = vmatprep.mubr.f32.mxu0 %v5991_v0 }
 0x260   :  { %1008 = vmatpush1.msra.mxu1 %v5039_v53  ;;  %1071 = vmatprep.mubr.f32.mxu1 %v5991_v0 }
 0x261   :  { %3681 = vmatprep.subr.bf16.mxu0 %v4738_v4  ;;  %3713 = vmatprep.subr.bf16.mxu1 %v4775_v17 }
 0x266   :  { %3385 = vmatmul.mubr.msk.f32.vlgmr.msra.gmra.mrb[4].mxu0 %vm277_vm0, %v3384_v61  ;;  %3386 = vmatmul.mubr.msk.f32.vlgmr.msra.gmra.mrb[4].mxu1 %vm277_vm0, %v3384_v61 }
 0x267   :  { %3683 = vmatpush1.bf16.msra.mxu0 %v4749_v8  ;;  %3715 = vmatpush1.bf16.msra.mxu1 %v4789_v22 }
 0x268   :  { %3685 = vmatprep.subr.bf16.mxu0 %v4751_v9  ;;  %3717 = vmatprep.subr.bf16.mxu1 %v4801_v26 }
 0x269   :  { %1172 = vmatprep.mubr.f32.mxu0 %v5991_v0  ;;  %1243 = vmatprep.mubr.f32.mxu1 %v5991_v0 }
 0x26b   :  { %3687 = vmatpush1.bf16.msra.mxu0 %v4773_v16  ;;  %3719 = vmatpush1.bf16.msra.mxu1 %v4820_v32 }
 0x26c   :  { %3689 = vmatprep.subr.bf16.mxu0 %v4787_v21  ;;  %3721 = vmatprep.subr.bf16.mxu1 %v4837_v38 }
 0x26f   :  { %3691 = vmatpush1.bf16.msra.mxu0 %v4817_v31  ;;  %3723 = vmatpush1.bf16.msra.mxu1 %v4855_v44 }
 0x270   :  { %3693 = vmatprep.subr.bf16.mxu0 %v4832_v36  ;;  %3725 = vmatprep.subr.bf16.mxu1 %v4867_v48 }
 0x273   :  { %3695 = vmatpush1.bf16.msra.mxu0 %v4861_v46  ;;  %3727 = vmatpush1.bf16.msra.mxu1 %v4894_v57 }
 0x274   :  { %3697 = vmatprep.subr.bf16.mxu0 %v4876_v51  ;;  %3729 = vmatprep.subr.bf16.mxu1 %v4903_v60 }
 0x277   :  { %3699 = vmatpush1.bf16.msra.mxu0 %v4897_v58  ;;  %3731 = vmatpush1.bf16.msra.mxu1 %v4930_v7 }
 0x278   :  { %3701 = vmatprep.subr.bf16.mxu0 %v4912_v63  ;;  %3733 = vmatprep.subr.bf16.mxu1 %v4939_v12 }
 0x27b   :  { %3703 = vmatpush1.bf16.msra.mxu0 %v4933_v10  ;;  %3735 = vmatpush1.bf16.msra.mxu1 %v4966_v25 }
 0x27c   :  { %3705 = vmatprep.subr.bf16.mxu0 %v4948_v15  ;;  %3737 = vmatprep.subr.bf16.mxu1 %v4975_v29 }
 0x27f   :  { %3707 = vmatpush1.bf16.msra.mxu0 %v4969_v27  ;;  %3739 = vmatpush1.bf16.msra.mxu1 %v4996_v40 }
 0x280   :  { %3709 = vmatprep.subr.bf16.mxu0 %v4984_v34  ;;  %3741 = vmatprep.subr.bf16.mxu1 %v5002_v42 }
 0x283   :  { %3711 = vmatpush1.bf16.msra.mxu0 %v4999_v41  ;;  %3743 = vmatpush1.bf16.msra.mxu1 %v5017_v49 }
 0x284   :  { %1253 = vmatprep.subr.mxu0 %v5014_v47  ;;  %1324 = vmatprep.subr.mxu1 %v5030_v52 }
 0x339   :  { %v1002_v6 = vpop.f32.mrb[4].mxu0  ;;  %v1073_v11 = vpop.f32.mrb[4].mxu1 }
 0x33a   :  { %v1078_v13 = vadd.f32 %v1002_v6, %v5095_v1  ;;  %v1004_v14 = vpop.f32.mrb[5].mxu0  ;;  %v1075_v18 = vpop.f32.mrb[5].mxu1  ;;  %v1080_v39 = vadd.f32 %v1073_v11, %v5112_v30 }
 0x33b   :  { %v1079_v19 = vadd.f32 %v1004_v14, %v5099_v2  ;;  %v1081_v33 = vadd.f32 %v1075_v18, %v5106_v23 }
 0x33c   :  { %v3387_v20 = vmul.f32 -1.442695, %v1078_v13 }
 0x33d   :  { %v3388_v28 = vmul.f32 -1.442695, %v1079_v19  ;;  %v3389_v37 = vmul.f32 -1.442695, %v1081_v33 }
 0x33e   :  { %4458 = vpow2.f32 %v3387_v20 }
 0x33f   :  { %4460 = vpow2.f32 %v3388_v28 }
 0x340   :  { %4462 = vpow2.f32 %v3389_v37  ;;  %v1807_v37 = vld [vmem:[#allocation5 + $0x10] sm:$0xff] }
 0x341   :  { %4464 = vtanh.f32 %v1080_v39  ;;  %v1811_v39 = vld [vmem:[#allocation5 + $0x30] sm:$0xff] }
 0x348   :  { %v4459_v45 = vpop.eup %4458 }
 0x349   :  { %v4461_v54 = vpop.eup %4460  ;;  %v1085_v35 = vadd.f32 1.0, %v4459_v45  ;;  %v5295_v45 = vpack.c.bf16 %v1811_v39, %v1807_v37  ;;  %v1846_v39 = vld [vmem:[#allocation5 + $0x148] sm:$0xff] }
 0x34a   :  { %v1091_v55 = vadd.f32 1.0, %v4461_v54  ;;  %v4463_v3 = vpop.eup %4462  ;;  %v1814_v54 = vld [vmem:[#allocation5 + $0x48] sm:$0xff] }
 0x34b   :  { %4466 = vrcp.f32 %v1085_v35  ;;  %v4465_v61 = vpop.eup %4464  ;;  %v1098_v19 = vadd.f32 1.0, %v4463_v3  ;;  %v1818_v35 = vld [vmem:[#allocation5 + $0x68] sm:$0xff] }
 0x34c   :  { %4468 = vrcp.f32 %v1091_v55  ;;  %v1816_v55 = vld [vmem:[#allocation5 + $0x58] sm:$0xff]  ;;  %v5300_v3 = vpack.c.bf16 %v1818_v35, %v1814_v54  ;;  %v1850_v54 = vld [vmem:[#allocation5 + $0x168] sm:$0xff] }
 0x34d   :  { %4470 = vrcp.f32 %v1098_v19  ;;  %v1848_v35 = vld [vmem:[#allocation5 + $0x158] sm:$0xff] }
 0x355   :  { %v4467_v6 = vpop.eup %4466 }
 0x356   :  { %v4469_v13 = vpop.eup %4468  ;;  %v1102_v14 = vmul.f32 %v4467_v6, %v4465_v61  ;;  %v1820_v61 = vld [vmem:[#allocation5 + $0x78] sm:$0xff]  ;;  %v1813_v6 = vld [vmem:[#allocation5 + $0x40] sm:$0xff] }
 0x357   :  { %v1101_v20 = vmul.f32 %v4469_v13, %v5168_v43  ;;  %v4471_v11 = vpop.eup %4470  ;;  %v3390_v43 = vld [vmem:[%s5976_s0 + $0x18] sm:$0xff]  ;;  %v1817_v13 = vld [vmem:[#allocation5 + $0x60] sm:$0xff] }
 0x358   :  { %v5304_v19 = vpack.c.bf16 %v1817_v13, %v1813_v6  ;;  %v1845_v6 = vld [vmem:[#allocation5 + $0x140] sm:$0xff] }
 0x359   :  { %v5221_v18 = vadd.f32 %v1102_v14, %v1101_v20  ;;  %v5302_v14 = vpack.c.bf16 %v1820_v61, %v1816_v55  ;;  %v1815_v20 = vld [vmem:[#allocation5 + $0x50] sm:$0xff]  ;;  %v5348_v55 = vpack.c.bf16 %v1850_v54, %v1846_v39  ;;  %v1852_v61 = vld [vmem:[#allocation5 + $0x178] sm:$0xff]  ;;  %v1849_v13 = vld [vmem:[#allocation5 + $0x160] sm:$0xff] }
 0x35a   :  { %v1867_v39 = vld [vmem:[#allocation5 + $0x1f0] sm:$0xff] }
 0x35b   :  { %4472 = vtanh.f32 %v5221_v18  ;;  %6059 = vst [vmem:[#allocation18_spill] sm:$0xff] %v5348_v55 }
 0x365   :  { %v4473_v28 = vpop.eup %4472 }
 0x366   :  { %v1105_v33 = vmul.f32 %v4473_v28, %v4471_v11  ;;  %v1822_v28 = vld [vmem:[#allocation5 + $0x88] sm:$0xff] }
 0x368   :  { %1173 = vmatmul.mubr.f32.vlgmr.msra.gmra.mrb[6].mxu0 %v1105_v33  ;;  %1244 = vmatmul.mubr.f32.vlgmr.msra.gmra.mrb[6].mxu1 %v1105_v33  ;;  %v1826_v33 = vld [vmem:[#allocation5 + $0xa8] sm:$0xff] }
 0x369   :  { %1254 = vmatpush1.msra.mxu0 %v5025_v50  ;;  %1317 = vmatprep.mubr.f32.mxu0 %v5991_v0 }
 0x36a   :  { %1325 = vmatpush1.msra.mxu1 %v5039_v53  ;;  %1388 = vmatprep.mubr.f32.mxu1 %v5991_v0 }
 0x36b   :  { %3745 = vmatprep.subr.bf16.mxu0 %v4738_v4  ;;  %3777 = vmatprep.subr.bf16.mxu1 %v4775_v17 }
 0x370   :  { %3391 = vmatmul.mubr.msk.f32.vlgmr.msra.gmra.mrb[6].mxu0 %vm277_vm0, %v3390_v43  ;;  %3392 = vmatmul.mubr.msk.f32.vlgmr.msra.gmra.mrb[6].mxu1 %vm277_vm0, %v3390_v43  ;;  %v1824_v43 = vld [vmem:[#allocation5 + $0x98] sm:$0xff] }
 0x371   :  { %3747 = vmatpush1.bf16.msra.mxu0 %v4749_v8  ;;  %3779 = vmatpush1.bf16.msra.mxu1 %v4789_v22 }
 0x372   :  { %3749 = vmatprep.subr.bf16.mxu0 %v4751_v9  ;;  %3781 = vmatprep.subr.bf16.mxu1 %v4801_v26 }
 0x373   :  { %1489 = vmatprep.mubr.f32.mxu0 %v5991_v0  ;;  %1560 = vmatprep.mubr.f32.mxu1 %v5991_v0 }
 0x375   :  { %3751 = vmatpush1.bf16.msra.mxu0 %v4773_v16  ;;  %3783 = vmatpush1.bf16.msra.mxu1 %v4820_v32 }
 0x376   :  { %3753 = vmatprep.subr.bf16.mxu0 %v4787_v21  ;;  %3785 = vmatprep.subr.bf16.mxu1 %v4837_v38 }
 0x379   :  { %3755 = vmatpush1.bf16.msra.mxu0 %v4817_v31  ;;  %3787 = vmatpush1.bf16.msra.mxu1 %v4855_v44 }
 0x37a   :  { %3757 = vmatprep.subr.bf16.mxu0 %v4832_v36  ;;  %3789 = vmatprep.subr.bf16.mxu1 %v4867_v48 }
 0x37d   :  { %3759 = vmatpush1.bf16.msra.mxu0 %v4861_v46  ;;  %3791 = vmatpush1.bf16.msra.mxu1 %v4894_v57 }
 0x37e   :  { %3761 = vmatprep.subr.bf16.mxu0 %v4876_v51  ;;  %3793 = vmatprep.subr.bf16.mxu1 %v4903_v60 }
 0x381   :  { %3763 = vmatpush1.bf16.msra.mxu0 %v4897_v58  ;;  %3795 = vmatpush1.bf16.msra.mxu1 %v4930_v7 }
 0x382   :  { %3765 = vmatprep.subr.bf16.mxu0 %v4912_v63  ;;  %3797 = vmatprep.subr.bf16.mxu1 %v4939_v12 }
 0x385   :  { %3767 = vmatpush1.bf16.msra.mxu0 %v4933_v10  ;;  %3799 = vmatpush1.bf16.msra.mxu1 %v4966_v25 }
 0x386   :  { %3769 = vmatprep.subr.bf16.mxu0 %v4948_v15  ;;  %3801 = vmatprep.subr.bf16.mxu1 %v4975_v29  ;;  %v3396_v29 = vld [vmem:[%s5976_s0 + $0x20] sm:$0xff]  ;;  %s4647_s0 = smov [#allocation7]  }
 0x387   :  { %s3363_s30 = sshll.u32 %s4647_s0, 4  ;;  %s3364_s30 = int_to_ptr.vmem [resolvable:$true] %s3363_s30 }
 0x388   :  { %s4614_s11 = scalar_lea.vmem %s3364_s30, 128  ;;  %p4619_p3 = scmp.lt.s32.totalorder %s3364_s30, %s3364_s30 }
 0x389   :  { %3771 = vmatpush1.bf16.msra.mxu0 %v4969_v27  ;;  %3803 = vmatpush1.bf16.msra.mxu1 %v4996_v40  ;;  %v1810_v40 = vld [vmem:[#allocation5 + $0x28] sm:$0xff]  ;;  %p4615_p2 = scmp.ne.s32.totalorder %s3364_s30, %s4614_s11  ;;  %p4620_p4 = scmp.lt.s32.totalorder %s4614_s11, %s4614_s11 }
 0x38a   :  { %3773 = vmatprep.subr.bf16.mxu0 %v4984_v34  ;;  %3805 = vmatprep.subr.bf16.mxu1 %v5002_v42  ;;  %v1806_v34 = vld [vmem:[#allocation5 + $0x8] sm:$0xff] }
 0x38b   :  { %v5288_v42 = vpack.c.bf16 %v1810_v40, %v1806_v34  ;;  %v1837_v34 = vld [vmem:[#allocation5 + $0x100] sm:$0xff]  ;;  %p4621_p5 = por %p4620_p4, %p4619_p3 }
 0x38c   :  { %v1841_v40 = vld [vmem:[#allocation5 + $0x120] sm:$0xff] }
 0x38d   :  { %3775 = vmatpush1.bf16.msra.mxu0 %v4999_v41  ;;  %3807 = vmatpush1.bf16.msra.mxu1 %v5017_v49  ;;  %v1808_v41 = vld [vmem:[#allocation5 + $0x18] sm:$0xff]  ;;  %v1805_v49 = vld [vmem:[#allocation5] sm:$0xff]  ;;  %p4622_p6 = pnand %p4621_p5, %p4615_p2 }
 0x38e   :  { %1570 = vmatprep.subr.mxu0 %v5014_v47  ;;  %1641 = vmatprep.subr.mxu1 %v5030_v52  ;;  %v1812_v47 = vld [vmem:[#allocation5 + $0x38] sm:$0xff] }
 0x38f   :  { %v5290_v52 = vpack.c.bf16 %v1812_v47, %v1808_v41  ;;  %v5340_v47 = vpack.c.bf16 %v1841_v40, %v1837_v34  ;;  %v1861_v34 = vld [vmem:[#allocation5 + $0x1c0] sm:$0xff] }
 0x391   :  { %6057 = vst [vmem:[#allocation16_spill] sm:$0xff] %v5340_v47 }
 0x443   :  { %v1319_v4 = vpop.f32.mrb[6].mxu0  ;;  %v1390_v8 = vpop.f32.mrb[6].mxu1 }
 0x444   :  { %v1395_v9 = vadd.f32 %v1319_v4, %v5095_v1  ;;  %v1321_v16 = vpop.f32.mrb[7].mxu0  ;;  %v1392_v17 = vpop.f32.mrb[7].mxu1  ;;  %v1397_v36 = vadd.f32 %v1390_v8, %v5112_v30  ;;  %v5312_v4 = vpack.c.bf16 %v1826_v33, %v1822_v28  ;;  %v1828_v8 = vld [vmem:[#allocation5 + $0xb8] sm:$0xff]  ;;  %v1847_v28 = vld [vmem:[#allocation5 + $0x150] sm:$0xff] }
 0x445   :  { %v1396_v21 = vadd.f32 %v1321_v16, %v5099_v2  ;;  %v1398_v31 = vadd.f32 %v1392_v17, %v5106_v23  ;;  %v1825_v16 = vld [vmem:[#allocation5 + $0xa0] sm:$0xff]  ;;  %v5314_v17 = vpack.c.bf16 %v1828_v8, %v1824_v43  ;;  %v1851_v33 = vld [vmem:[#allocation5 + $0x170] sm:$0xff]  ;;  %v1854_v43 = vld [vmem:[#allocation5 + $0x188] sm:$0xff] }
 0x446   :  { %v3393_v22 = vmul.f32 -1.442695, %v1395_v9  ;;  %v1821_v9 = vld [vmem:[#allocation5 + $0x80] sm:$0xff]  ;;  %v5355_v8 = vpack.c.bf16 %v1851_v33, %v1847_v28  ;;  %v1748_v33 = vld [vmem:[#allocation2 + $0x38] sm:$0xff] }
 0x447   :  { %v3394_v26 = vmul.f32 -1.442695, %v1396_v21  ;;  %v3395_v32 = vmul.f32 -1.442695, %v1398_v31  ;;  %v5316_v21 = vpack.c.bf16 %v1825_v16, %v1821_v9  ;;  %v1858_v9 = vld [vmem:[#allocation5 + $0x1a8] sm:$0xff]  ;;  %v1856_v16 = vld [vmem:[#allocation5 + $0x198] sm:$0xff] }
 0x448   :  { %4474 = vpow2.f32 %v3393_v22  ;;  %v1823_v22 = vld [vmem:[#allocation5 + $0x90] sm:$0xff]  ;;  %6062 = vst [vmem:[#allocation21_spill] sm:$0xff] %v5355_v8 }
 0x449   :  { %4476 = vpow2.f32 %v3394_v26  ;;  %v1827_v26 = vld [vmem:[#allocation5 + $0xb0] sm:$0xff] }
 0x44a   :  { %4478 = vpow2.f32 %v3395_v32  ;;  %v5319_v31 = vpack.c.bf16 %v1827_v26, %v1823_v22  ;;  %v1830_v32 = vld [vmem:[#allocation5 + $0xc8] sm:$0xff]  ;;  %v1860_v22 = vld [vmem:[#allocation5 + $0x1b8] sm:$0xff]  ;;  %v5359_v26 = vpack.c.bf16 %v1858_v9, %v1854_v43 }
 0x44b   :  { %4480 = vtanh.f32 %v1397_v36  ;;  %v1834_v36 = vld [vmem:[#allocation5 + $0xe8] sm:$0xff] }
 0x44c   :  { %6063 = vst [vmem:[#allocation22_spill] sm:$0xff] %v5359_v26 }
 0x452   :  { %v4475_v38 = vpop.eup %4474 }
 0x453   :  { %v4477_v44 = vpop.eup %4476  ;;  %v1402_v46 = vadd.f32 1.0, %v4475_v38  ;;  %v1832_v38 = vld [vmem:[#allocation5 + $0xd8] sm:$0xff] }
 0x454   :  { %v1408_v48 = vadd.f32 1.0, %v4477_v44  ;;  %v4479_v51 = vpop.eup %4478  ;;  %v5324_v44 = vpack.c.bf16 %v1834_v36, %v1830_v32  ;;  %v5361_v32 = vpack.c.bf16 %v1860_v22, %v1856_v16  ;;  %v1853_v36 = vld [vmem:[#allocation5 + $0x180] sm:$0xff] }
 0x455   :  { %4482 = vrcp.f32 %v1402_v46  ;;  %v4481_v57 = vpop.eup %4480  ;;  %v1415_v7 = vadd.f32 1.0, %v4479_v51  ;;  %v1836_v46 = vld [vmem:[#allocation5 + $0xf8] sm:$0xff]  ;;  %v1833_v51 = vld [vmem:[#allocation5 + $0xe0] sm:$0xff] }
 0x456   :  { %4484 = vrcp.f32 %v1408_v48  ;;  %v1829_v48 = vld [vmem:[#allocation5 + $0xc0] sm:$0xff]  ;;  %6064 = vst [vmem:[#allocation23_spill] sm:$0xff] %v5361_v32 }
 0x457   :  { %4486 = vrcp.f32 %v1415_v7 }
 0x45f   :  { %v4483_v58 = vpop.eup %4482 }
 0x460   :  { %v4485_v60 = vpop.eup %4484  ;;  %v1419_v63 = vmul.f32 %v4483_v58, %v4481_v57  ;;  %v5326_v57 = vpack.c.bf16 %v1836_v46, %v1832_v38  ;;  %v5328_v58 = vpack.c.bf16 %v1833_v51, %v1829_v48  ;;  %v1857_v38 = vld [vmem:[#allocation5 + $0x1a0] sm:$0xff]  ;;  %v1855_v46 = vld [vmem:[#allocation5 + $0x190] sm:$0xff] }
 0x461   :  { %v1418_v10 = vmul.f32 %v4485_v60, %v5221_v18  ;;  %v4487_v15 = vpop.eup %4486  ;;  %v1819_v18 = vld [vmem:[#allocation5 + $0x70] sm:$0xff]  ;;  %v5364_v48 = vpack.c.bf16 %v1857_v38, %v1853_v36 }
 0x462   :  { %v5307_v11 = vpack.c.bf16 %v1819_v18, %v1815_v20  ;;  %6052 = vst [vmem:[#allocation11_spill] sm:$0xff] %v5326_v57  ;;  %6053 = vst [vmem:[#allocation12_spill] sm:$0xff] %v5328_v58  ;;  %v1831_v60 = vld [vmem:[#allocation5 + $0xd0] sm:$0xff]  ;;  %v5350_v20 = vpack.c.bf16 %v1852_v61, %v1848_v35  ;;  %v5352_v18 = vpack.c.bf16 %v1849_v13, %v1845_v6  ;;  %v1742_v35 = vld [vmem:[#allocation2 + $0x8] sm:$0xff] }
 0x463   :  { %v5274_v12 = vadd.f32 %v1419_v63, %v1418_v10  ;;  %v1835_v63 = vld [vmem:[#allocation5 + $0xf0] sm:$0xff]  ;;  %v1838_v10 = vld [vmem:[#allocation5 + $0x108] sm:$0xff]  ;;  %6065 = vst [vmem:[#allocation24_spill] sm:$0xff] %v5364_v48  ;;  %v1744_v6 = vld [vmem:[#allocation2 + $0x18] sm:$0xff] }
 0x464   :  { %v5331_v7 = vpack.c.bf16 %v1835_v63, %v1831_v60  ;;  %6060 = vst [vmem:[#allocation19_spill] sm:$0xff] %v5350_v20  ;;  %6061 = vst [vmem:[#allocation20_spill] sm:$0xff] %v5352_v18  ;;  %v1859_v51 = vld [vmem:[#allocation5 + $0x1b0] sm:$0xff]  ;;  %v1862_v60 = vld [vmem:[#allocation5 + $0x1c8] sm:$0xff]  ;;  %v5384_v43 = vpack.c.bf16 %v1748_v33, %v1744_v6 }
 0x465   :  { %4488 = vtanh.f32 %v5274_v12  ;;  %v1866_v63 = vld [vmem:[#allocation5 + $0x1e8] sm:$0xff] }
 0x466   :  { %6054 = vst [vmem:[#allocation13_spill] sm:$0xff] %v5331_v7  ;;  %v1746_v61 = vld [vmem:[#allocation2 + $0x28] sm:$0xff]  ;;  %6072 = vst [vmem:[#allocation31_spill] sm:$0xff] %v5384_v43 }
 0x467   :  { %v5381_v28 = vpack.c.bf16 %v1746_v61, %v1742_v35 }
 0x469   :  { %6071 = vst [vmem:[#allocation30_spill] sm:$0xff] %v5381_v28 }
 0x46f   :  { %v4489_v25 = vpop.eup %4488 }
 0x470   :  { %v1422_v27 = vmul.f32 %v4489_v25, %v4487_v15  ;;  %v1842_v15 = vld [vmem:[#allocation5 + $0x128] sm:$0xff]  ;;  %v1840_v25 = vld [vmem:[#allocation5 + $0x118] sm:$0xff] }
 0x472   :  { %1490 = vmatmul.mubr.f32.vlgmr.msra.gmra.mrb[8].mxu0 %v1422_v27  ;;  %1561 = vmatmul.mubr.f32.vlgmr.msra.gmra.mrb[8].mxu1 %v1422_v27  ;;  %v5336_v27 = vpack.c.bf16 %v1842_v15, %v1838_v10  ;;  %v5368_v10 = vpack.c.bf16 %v1859_v51, %v1855_v46  ;;  %v5370_v15 = vpack.c.bf16 %v1866_v63, %v1862_v60 }
 0x473   :  { %1571 = vmatpush1.msra.mxu0 %v5025_v50  ;;  %1634 = vmatprep.mubr.f32.mxu0 %v5991_v0  ;;  %v1809_v50 = vld [vmem:[#allocation5 + $0x20] sm:$0xff] }
 0x474   :  { %1642 = vmatpush1.msra.mxu1 %v5039_v53  ;;  %1705 = vmatprep.mubr.f32.mxu1 %v5991_v0  ;;  %v5292_v53 = vpack.c.bf16 %v1809_v50, %v1805_v49  ;;  %6055 = vst [vmem:[#allocation14_spill] sm:$0xff] %v5336_v27  ;;  %v1839_v49 = vld [vmem:[#allocation5 + $0x110] sm:$0xff]  ;;  %6066 = vst [vmem:[#allocation25_spill] sm:$0xff] %v5368_v10 }
 0x475   :  { %3809 = vmatprep.subr.bf16.mxu0 %v5288_v42  ;;  %3841 = vmatprep.subr.bf16.mxu1 %v5290_v52  ;;  %v1843_v50 = vld [vmem:[#allocation5 + $0x130] sm:$0xff]  ;;  %6067 = vst [vmem:[#allocation26_spill] sm:$0xff] %v5370_v15 }
 0x476   :  { %v5343_v37 = vpack.c.bf16 %v1843_v50, %v1839_v49  ;;  %v1865_v49 = vld [vmem:[#allocation5 + $0x1e0] sm:$0xff]  ;;  %v1863_v50 = vld [vmem:[#allocation5 + $0x1d0] sm:$0xff] }
 0x477   :  { %v5375_v54 = vpack.c.bf16 %v1865_v49, %v1861_v34  ;;  %v5379_v13 = vpack.c.bf16 %v1867_v39, %v1863_v50 }
 0x478   :  { %6058 = vst [vmem:[#allocation17_spill] sm:$0xff] %v5343_v37 }
 0x479   :  { %6069 = vst [vmem:[#allocation28_spill] sm:$0xff] %v5375_v54  ;;  %6070 = vst [vmem:[#allocation29_spill] sm:$0xff] %v5379_v13 }
 0x47a   :  { %3397 = vmatmul.mubr.msk.f32.vlgmr.msra.gmra.mrb[8].mxu0 %vm277_vm0, %v3396_v29  ;;  %3398 = vmatmul.mubr.msk.f32.vlgmr.msra.gmra.mrb[8].mxu1 %vm277_vm0, %v3396_v29  ;;  %v1844_v29 = vld [vmem:[#allocation5 + $0x138] sm:$0xff] }
 0x47b   :  { %1933 = vmatprep.mubr.f32.mxu0 %v5991_v0  ;;  %2004 = vmatprep.mubr.f32.mxu1 %v5991_v0  ;;  %v5338_v41 = vpack.c.bf16 %v1844_v29, %v1840_v25  ;;  %v1864_v25 = vld [vmem:[#allocation5 + $0x1d8] sm:$0xff] }
 0x47c   :  { %3811 = vmatpush1.bf16.msra.mxu0 %v5292_v53  ;;  %3843 = vmatpush1.bf16.msra.mxu1 %v5295_v45  ;;  %v1868_v29 = vld [vmem:[#allocation5 + $0x1f8] sm:$0xff] }
 0x47d   :  { %3813 = vmatprep.subr.bf16.mxu0 %v5300_v3  ;;  %3845 = vmatprep.subr.bf16.mxu1 %v5302_v14  ;;  %6056 = vst [vmem:[#allocation15_spill] sm:$0xff] %v5338_v41  ;;  %v5372_v40 = vpack.c.bf16 %v1868_v29, %v1864_v25 }
 0x47f   :  { %6068 = vst [vmem:[#allocation27_spill] sm:$0xff] %v5372_v40 }
 0x480   :  { %3815 = vmatpush1.bf16.msra.mxu0 %v5304_v19  ;;  %3847 = vmatpush1.bf16.msra.mxu1 %v5307_v11 }
 0x481   :  { %3817 = vmatprep.subr.bf16.mxu0 %v5312_v4  ;;  %3849 = vmatprep.subr.bf16.mxu1 %v5314_v17 }
 0x484   :  { %3819 = vmatpush1.bf16.msra.mxu0 %v5316_v21  ;;  %3851 = vmatpush1.bf16.msra.mxu1 %v5319_v31 }
 0x485   :  { %3821 = vmatprep.subr.bf16.mxu0 %v5324_v44  ;;  %3853 = vmatprep.subr.bf16.mxu1 %v5326_v57 }
 0x488   :  { %3823 = vmatpush1.bf16.msra.mxu0 %v5328_v58  ;;  %3855 = vmatpush1.bf16.msra.mxu1 %v5331_v7 }
 0x489   :  { %3825 = vmatprep.subr.bf16.mxu0 %v5336_v27  ;;  %3857 = vmatprep.subr.bf16.mxu1 %v5338_v41 }
 0x48c   :  { %3827 = vmatpush1.bf16.msra.mxu0 %v5340_v47  ;;  %3859 = vmatpush1.bf16.msra.mxu1 %v5343_v37 }
 0x48d   :  { %3829 = vmatprep.subr.bf16.mxu0 %v5348_v55  ;;  %3861 = vmatprep.subr.bf16.mxu1 %v5350_v20 }
 0x490   :  { %3831 = vmatpush1.bf16.msra.mxu0 %v5352_v18  ;;  %3863 = vmatpush1.bf16.msra.mxu1 %v5355_v8 }
 0x491   :  { %3833 = vmatprep.subr.bf16.mxu0 %v5359_v26  ;;  %3865 = vmatprep.subr.bf16.mxu1 %v5361_v32 }
 0x494   :  { %3835 = vmatpush1.bf16.msra.mxu0 %v5364_v48  ;;  %3867 = vmatpush1.bf16.msra.mxu1 %v5368_v10 }
 0x495   :  { %3837 = vmatprep.subr.bf16.mxu0 %v5370_v15  ;;  %3869 = vmatprep.subr.bf16.mxu1 %v5372_v40 }
 0x498   :  { %3839 = vmatpush1.bf16.msra.mxu0 %v5375_v54  ;;  %3871 = vmatpush1.bf16.msra.mxu1 %v5379_v13 }
 0x499   :  { %3873 = vmatprep.subr.bf16.mxu0 %v5381_v28  ;;  %3905 = vmatprep.subr.bf16.mxu1 %v5384_v43 }
 0x54d   :  { %v1636_v9 = vpop.f32.mrb[8].mxu0  ;;  %v1707_v16 = vpop.f32.mrb[8].mxu1 }
 0x54e   :  { %v1712_v22 = vadd.f32 %v1636_v9, %v5095_v1  ;;  %v1638_v36 = vpop.f32.mrb[9].mxu0  ;;  %v1709_v38 = vpop.f32.mrb[9].mxu1  ;;  %v1714_v29 = vadd.f32 %v1707_v16, %v5112_v30  ;;  %v1741_v30 = vld [vmem:[#allocation2] sm:$0xff] }
 0x54f   :  { %v1713_v46 = vadd.f32 %v1638_v36, %v5099_v2  ;;  %v1715_v63 = vadd.f32 %v1709_v38, %v5106_v23  ;;  %v1745_v16 = vld [vmem:[#allocation2 + $0x20] sm:$0xff]  ;;  %v1747_v36 = vld [vmem:[#allocation2 + $0x30] sm:$0xff]  ;;  %v1750_v38 = vld [vmem:[#allocation2 + $0x48] sm:$0xff] }
 0x550   :  { %v3399_v51 = vmul.f32 -1.442695, %v1712_v22  ;;  %v1743_v22 = vld [vmem:[#allocation2 + $0x10] sm:$0xff] }
 0x551   :  { %v3400_v60 = vmul.f32 -1.442695, %v1713_v46  ;;  %v3401_v25 = vmul.f32 -1.442695, %v1715_v63  ;;  %v1754_v46 = vld [vmem:[#allocation2 + $0x68] sm:$0xff] }
 0x552   :  { %4490 = vpow2.f32 %v3399_v51  ;;  %v1752_v51 = vld [vmem:[#allocation2 + $0x58] sm:$0xff] }
 0x553   :  { %4492 = vpow2.f32 %v3400_v60  ;;  %v1756_v60 = vld [vmem:[#allocation2 + $0x78] sm:$0xff] }
 0x554   :  { %4494 = vpow2.f32 %v3401_v25 }
 0x555   :  { %4496 = vtanh.f32 %v1714_v29  ;;  %v5398_v29 = vpack.c.bf16 %v1745_v16, %v1741_v30 }
 0x55c   :  { %v4491_v34 = vpop.eup %4490 }
 0x55d   :  { %v4493_v49 = vpop.eup %4492  ;;  %v1719_v50 = vadd.f32 1.0, %v4491_v34  ;;  %v5400_v34 = vpack.c.bf16 %v1747_v36, %v1743_v22  ;;  %v1757_v22 = vld [vmem:[#allocation2 + $0x80] sm:$0xff] }
 0x55e   :  { %v1725_v39 = vadd.f32 1.0, %v4493_v49  ;;  %v4495_v1 = vpop.eup %4494  ;;  %v1753_v49 = vld [vmem:[#allocation2 + $0x60] sm:$0xff] }
 0x55f   :  { %4498 = vrcp.f32 %v1719_v50  ;;  %v4497_v35 = vpop.eup %4496  ;;  %v1732_v33 = vadd.f32 1.0, %v4495_v1  ;;  %v5404_v1 = vpack.c.bf16 %v1756_v60, %v1752_v51  ;;  %v1761_v36 = vld [vmem:[#allocation2 + $0xa0] sm:$0xff]  ;;  %v1759_v51 = vld [vmem:[#allocation2 + $0x90] sm:$0xff] }
 0x560   :  { %4500 = vrcp.f32 %v1725_v39  ;;  %v5402_v39 = vpack.c.bf16 %v1754_v46, %v1750_v38  ;;  %v1763_v60 = vld [vmem:[#allocation2 + $0xb0] sm:$0xff] }
 0x561   :  { %4502 = vrcp.f32 %v1732_v33  ;;  %v1760_v33 = vld [vmem:[#allocation2 + $0x98] sm:$0xff] }
 0x569   :  { %v4499_v2 = vpop.eup %4498 }
 0x56a   :  { %v4501_v61 = vpop.eup %4500  ;;  %v1736_v6 = vmul.f32 %v4499_v2, %v4497_v35  ;;  %v1751_v35 = vld [vmem:[#allocation2 + $0x50] sm:$0xff] }
 0x56b   :  { %v1735_v9 = vmul.f32 %v4501_v61, %v5274_v12  ;;  %v4503_v63 = vpop.eup %4502  ;;  %v1749_v12 = vld [vmem:[#allocation2 + $0x40] sm:$0xff]  ;;  %v1755_v2 = vld [vmem:[#allocation2 + $0x70] sm:$0xff]  ;;  %v1758_v61 = vld [vmem:[#allocation2 + $0x88] sm:$0xff] }
 0x56c   :  { %v5408_v30 = vpack.c.bf16 %v1753_v49, %v1749_v12  ;;  %v5410_v16 = vpack.c.bf16 %v1755_v2, %v1751_v35  ;;  %v5422_v12 = vpack.c.bf16 %v1761_v36, %v1757_v22  ;;  %v5424_v49 = vpack.c.bf16 %v1763_v60, %v1759_v51  ;;  %v1765_v35 = vld [vmem:[#allocation2 + $0xc0] sm:$0xff] }
 0x56d   :  { %v5395_v23 = vadd.f32 %v1736_v6, %v1735_v9  ;;  %v1762_v6 = vld [vmem:[#allocation2 + $0xa8] sm:$0xff]  ;;  %v1764_v9 = vld [vmem:[#allocation2 + $0xb8] sm:$0xff]  ;;  %v1769_v2 = vld [vmem:[#allocation2 + $0xe0] sm:$0xff] }
 0x56e   :  { %v5414_v38 = vpack.c.bf16 %v1762_v6, %v1758_v61  ;;  %v5416_v46 = vpack.c.bf16 %v1764_v9, %v1760_v33  ;;  %6075 = vst [vmem:[#allocation34_spill] sm:$0xff] %v5422_v12  ;;  %6076 = vst [vmem:[#allocation35_spill] sm:$0xff] %v5424_v49  ;;  %v1767_v33 = vld [vmem:[#allocation2 + $0xd0] sm:$0xff]  ;;  %v5434_v22 = vpack.c.bf16 %v1769_v2, %v1765_v35  ;;  %v1773_v51 = vld [vmem:[#allocation2 + $0x100] sm:$0xff] }
 0x56f   :  { %4504 = vtanh.f32 %v5395_v23  ;;  %v1771_v9 = vld [vmem:[#allocation2 + $0xf0] sm:$0xff]  ;;  %v1777_v60 = vld [vmem:[#allocation2 + $0x120] sm:$0xff] }
 0x570   :  { %6073 = vst [vmem:[#allocation32_spill] sm:$0xff] %v5414_v38  ;;  %6074 = vst [vmem:[#allocation33_spill] sm:$0xff] %v5416_v46  ;;  %v5436_v36 = vpack.c.bf16 %v1771_v9, %v1767_v33  ;;  %v5446_v35 = vpack.c.bf16 %v1777_v60, %v1773_v51  ;;  %v1781_v33 = vld [vmem:[#allocation2 + $0x140] sm:$0xff] }
 0x571   :  { %6079 = vst [vmem:[#allocation38_spill] sm:$0xff] %v5434_v22  ;;  %v1785_v9 = vld [vmem:[#allocation2 + $0x160] sm:$0xff] }
 0x572   :  { %6080 = vst [vmem:[#allocation39_spill] sm:$0xff] %v5436_v36  ;;  %6083 = vst [vmem:[#allocation42_spill] sm:$0xff] %v5446_v35  ;;  %v5458_v51 = vpack.c.bf16 %v1785_v9, %v1781_v33 }
 0x579   :  { %v4505_v25 = vpop.eup %4504 }
 0x57a   :  { %v1739_v50 = vmul.f32 %v4505_v25, %v4503_v63  ;;  %v1766_v63 = vld [vmem:[#allocation2 + $0xc8] sm:$0xff] }
 0x57b   :  { %v1770_v25 = vld [vmem:[#allocation2 + $0xe8] sm:$0xff] }
 0x57c   :  { %1934 = vmatmul.mubr.f32.vlgmr.msra.gmra.mrb[10].mxu0 %v1739_v50  ;;  %2005 = vmatmul.mubr.f32.vlgmr.msra.gmra.mrb[10].mxu1 %v1739_v50  ;;  %v1768_v50 = vld [vmem:[#allocation2 + $0xd8] sm:$0xff]  ;;  %v5428_v61 = vpack.c.bf16 %v1770_v25, %v1766_v63  ;;  %v1775_v25 = vld [vmem:[#allocation2 + $0x110] sm:$0xff] }
 0x57d   :  { %3875 = vmatpush1.bf16.msra.mxu0 %v5398_v29  ;;  %3907 = vmatpush1.bf16.msra.mxu1 %v5400_v34  ;;  %v5430_v6 = vpack.c.bf16 %v1772_v24, %v1768_v50  ;;  %v5440_v24 = vpack.c.bf16 %v1778_v62, %v1774_v5  ;;  %v1779_v50 = vld [vmem:[#allocation2 + $0x130] sm:$0xff] }
 0x57e   :  { %3877 = vmatprep.subr.bf16.mxu0 %v5402_v39  ;;  %3909 = vmatprep.subr.bf16.mxu1 %v5404_v1  ;;  %6077 = vst [vmem:[#allocation36_spill] sm:$0xff] %v5428_v61  ;;  %v5448_v2 = vpack.c.bf16 %v1779_v50, %v1775_v25  ;;  %v1783_v62 = vld [vmem:[#allocation2 + $0x150] sm:$0xff]  ;;  %v1789_v25 = vld [vmem:[#allocation2 + $0x180] sm:$0xff] }
 0x57f   :  { %2075 = vmatprep.mubr.f32.mxu0 %v5991_v0  ;;  %2146 = vmatprep.mubr.f32.mxu1 %v5991_v0  ;;  %6078 = vst [vmem:[#allocation37_spill] sm:$0xff] %v5430_v6  ;;  %v1780_v0 = vld [vmem:[#allocation2 + $0x138] sm:$0xff]  ;;  %6081 = vst [vmem:[#allocation40_spill] sm:$0xff] %v5440_v24  ;;  %v1787_v5 = vld [vmem:[#allocation2 + $0x170] sm:$0xff] }
 0x580   :  { %v5442_v63 = vpack.c.bf16 %v1780_v0, %v1776_v59  ;;  %6084 = vst [vmem:[#allocation43_spill] sm:$0xff] %v5448_v2  ;;  %v5460_v60 = vpack.c.bf16 %v1787_v5, %v1783_v62  ;;  %v1793_v50 = vld [vmem:[#allocation2 + $0x1a0] sm:$0xff]  ;;  %v1803_v5 = vld [vmem:[#allocation2 + $0x1f0] sm:$0xff] }
 0x581   :  { %3879 = vmatpush1.bf16.msra.mxu0 %v5408_v30  ;;  %3911 = vmatpush1.bf16.msra.mxu1 %v5410_v16  ;;  %v5470_v33 = vpack.c.bf16 %v1793_v50, %v1789_v25  ;;  %v1797_v62 = vld [vmem:[#allocation2 + $0x1c0] sm:$0xff] }
 0x582   :  { %3881 = vmatprep.subr.bf16.mxu0 %v5414_v38  ;;  %3913 = vmatprep.subr.bf16.mxu1 %v5416_v46  ;;  %6082 = vst [vmem:[#allocation41_spill] sm:$0xff] %v5442_v63  ;;  %v1782_v46 = vld [vmem:[#allocation2 + $0x148] sm:$0xff]  ;;  %v1784_v38 = vld [vmem:[#allocation2 + $0x158] sm:$0xff] }
 0x585   :  { %3883 = vmatpush1.bf16.msra.mxu0 %v5422_v12  ;;  %3915 = vmatpush1.bf16.msra.mxu1 %v5424_v49  ;;  %v1786_v12 = vld [vmem:[#allocation2 + $0x168] sm:$0xff]  ;;  %v1788_v49 = vld [vmem:[#allocation2 + $0x178] sm:$0xff] }
 0x586   :  { %3885 = vmatprep.subr.bf16.mxu0 %v5428_v61  ;;  %3917 = vmatprep.subr.bf16.mxu1 %v5430_v6  ;;  %v5452_v0 = vpack.c.bf16 %v1786_v12, %v1782_v46  ;;  %v5454_v59 = vpack.c.bf16 %v1788_v49, %v1784_v38  ;;  %v1790_v6 = vld [vmem:[#allocation2 + $0x188] sm:$0xff]  ;;  %v1792_v61 = vld [vmem:[#allocation2 + $0x198] sm:$0xff]  ;;  %v1791_v12 = vld [vmem:[#allocation2 + $0x190] sm:$0xff] }
 0x587   :  { %v1795_v49 = vld [vmem:[#allocation2 + $0x1b0] sm:$0xff] }
 0x588   :  { %v5472_v9 = vpack.c.bf16 %v1795_v49, %v1791_v12  ;;  %v6088_v49 = vsub.s32 1, %v5086_v56 }
 0x589   :  { %3887 = vmatpush1.bf16.msra.mxu0 %v5434_v22  ;;  %3919 = vmatpush1.bf16.msra.mxu1 %v5436_v36  ;;  %v1794_v22 = vld [vmem:[#allocation2 + $0x1a8] sm:$0xff]  ;;  %v1796_v36 = vld [vmem:[#allocation2 + $0x1b8] sm:$0xff] }
 0x58a   :  { %3889 = vmatprep.subr.bf16.mxu0 %v5440_v24  ;;  %3921 = vmatprep.subr.bf16.mxu1 %v5442_v63  ;;  %v5464_v38 = vpack.c.bf16 %v1794_v22, %v1790_v6  ;;  %v5466_v46 = vpack.c.bf16 %v1796_v36, %v1792_v61  ;;  %v1798_v63 = vld [vmem:[#allocation2 + $0x1c8] sm:$0xff]  ;;  %v1800_v24 = vld [vmem:[#allocation2 + $0x1d8] sm:$0xff]  ;;  %v1801_v22 = vld [vmem:[#allocation2 + $0x1e0] sm:$0xff] }
 0x58b   :  { %v1799_v36 = vld [vmem:[#allocation2 + $0x1d0] sm:$0xff]  ;;  %v5482_v25 = vpack.c.bf16 %v1801_v22, %v1797_v62 }
 0x58c   :  { %v5484_v50 = vpack.c.bf16 %v1803_v5, %v1799_v36 }
 0x58d   :  { %3891 = vmatpush1.bf16.msra.mxu0 %v5446_v35  ;;  %3923 = vmatpush1.bf16.msra.mxu1 %v5448_v2  ;;  %v1802_v35 = vld [vmem:[#allocation2 + $0x1e8] sm:$0xff]  ;;  %v1804_v2 = vld [vmem:[#allocation2 + $0x1f8] sm:$0xff] }
 0x58e   :  { %3893 = vmatprep.subr.bf16.mxu0 %v5452_v0  ;;  %3925 = vmatprep.subr.bf16.mxu1 %v5454_v59  ;;  %v5476_v61 = vpack.c.bf16 %v1802_v35, %v1798_v63  ;;  %v5478_v6 = vpack.c.bf16 %v1804_v2, %v1800_v24  ;;  %v1740_v24 = vld [vmem:[%s5977_s1] sm:$0xff]  ;;  %v6085_v63 = vmov 0.0   ;;  %v6086_v2 = vsub.s32 0, %v5086_v56 }
 0x58f   :  { %v65_v35 = vld [vmem:[%s5983_s7] sm:$0xf] }
 0x590   :  { %v5534_v12 = vrot.slane %v65_v35, %v6086_v2  ;;  %v5538_v62 = vrot.slane %v65_v35, %v6088_v49  ;;  %v6091_v49 = vsub.s32 2, %v5086_v56 }
 0x591   :  { %3895 = vmatpush1.bf16.msra.mxu0 %v5458_v51  ;;  %3927 = vmatpush1.bf16.msra.mxu1 %v5460_v60 }
 0x592   :  { %3897 = vmatprep.subr.bf16.mxu0 %v5464_v38  ;;  %3929 = vmatprep.subr.bf16.mxu1 %v5466_v46  ;;  %6087 = vst [vmem:[#allocation44_spill] sm:$0xff] %v5534_v12 }
 0x595   :  { %3899 = vmatpush1.bf16.msra.mxu0 %v5470_v33  ;;  %3931 = vmatpush1.bf16.msra.mxu1 %v5472_v9 }
 0x596   :  { %3901 = vmatprep.subr.bf16.mxu0 %v5476_v61  ;;  %3933 = vmatprep.subr.bf16.mxu1 %v5478_v6 }
 0x599   :  { %3903 = vmatpush1.bf16.msra.mxu0 %v5482_v25  ;;  %3935 = vmatpush1.bf16.msra.mxu1 %v5484_v50 }
 0x59a   :  { %3937 = vmatprep.subr.bf16.mxu0 %v5288_v42  ;;  %3969 = vmatprep.subr.bf16.mxu1 %v5290_v52 }
 0x59c   :  { %2076 = vmatmul.mubr.f32.vlgmr.msra.gmra.mrb[10].mxu0 %v1740_v24  ;;  %2147 = vmatmul.mubr.f32.vlgmr.msra.gmra.mrb[10].mxu1 %v1740_v24 }
 0x59d   :  { %3939 = vmatpush1.bf16.msra.mxu0 %v5292_v53  ;;  %3971 = vmatpush1.bf16.msra.mxu1 %v5295_v45 }
 0x59e   :  { %3941 = vmatprep.subr.bf16.mxu0 %v5300_v3  ;;  %3973 = vmatprep.subr.bf16.mxu1 %v5302_v14 }
 0x59f   :  { %2268 = vmatprep.mubr.f32.mxu0 %v6085_v63  ;;  %2339 = vmatprep.mubr.f32.mxu1 %v6085_v63 }
 0x5a1   :  { %3943 = vmatpush1.bf16.msra.mxu0 %v5304_v19  ;;  %3975 = vmatpush1.bf16.msra.mxu1 %v5307_v11 }
 0x5a2   :  { %3945 = vmatprep.subr.bf16.mxu0 %v5312_v4  ;;  %3977 = vmatprep.subr.bf16.mxu1 %v5314_v17 }
 0x5a5   :  { %3947 = vmatpush1.bf16.msra.mxu0 %v5316_v21  ;;  %3979 = vmatpush1.bf16.msra.mxu1 %v5319_v31 }
 0x5a6   :  { %3949 = vmatprep.subr.bf16.mxu0 %v5324_v44  ;;  %3981 = vmatprep.subr.bf16.mxu1 %v5326_v57 }
 0x5a9   :  { %3951 = vmatpush1.bf16.msra.mxu0 %v5328_v58  ;;  %3983 = vmatpush1.bf16.msra.mxu1 %v5331_v7 }
 0x5aa   :  { %3953 = vmatprep.subr.bf16.mxu0 %v5336_v27  ;;  %3985 = vmatprep.subr.bf16.mxu1 %v5338_v41 }
 0x5ad   :  { %3955 = vmatpush1.bf16.msra.mxu0 %v5340_v47  ;;  %3987 = vmatpush1.bf16.msra.mxu1 %v5343_v37 }
 0x5ae   :  { %3957 = vmatprep.subr.bf16.mxu0 %v5348_v55  ;;  %3989 = vmatprep.subr.bf16.mxu1 %v5350_v20 }
 0x5b1   :  { %3959 = vmatpush1.bf16.msra.mxu0 %v5352_v18  ;;  %3991 = vmatpush1.bf16.msra.mxu1 %v5355_v8 }
 0x5b2   :  { %3961 = vmatprep.subr.bf16.mxu0 %v5359_v26  ;;  %3993 = vmatprep.subr.bf16.mxu1 %v5361_v32 }
 0x5b5   :  { %3963 = vmatpush1.bf16.msra.mxu0 %v5364_v48  ;;  %3995 = vmatpush1.bf16.msra.mxu1 %v5368_v10  ;;  %v5549_v10 = vrot.slane %v65_v35, %v6091_v49  ;;  %v6097_v49 = vld [vmem:[#allocation36_spill] sm:$0xff] }
 0x5b6   :  { %3965 = vmatprep.subr.bf16.mxu0 %v5370_v15  ;;  %3997 = vmatprep.subr.bf16.mxu1 %v5372_v40  ;;  %v6089_v40 = vsub.s32 3, %v5086_v56 }
 0x5b8   :  { %v5544_v15 = vrot.slane %v65_v35, %v6089_v40 }
 0x5b9   :  { %3967 = vmatpush1.bf16.msra.mxu0 %v5375_v54  ;;  %3999 = vmatpush1.bf16.msra.mxu1 %v5379_v13 }
 0x5ba   :  { %4001 = vmatprep.subr.bf16.mxu0 %v5381_v28  ;;  %4033 = vmatprep.subr.bf16.mxu1 %v5384_v43  ;;  %6090 = vst [vmem:[#allocation45_spill] sm:$0xff] %v5544_v15 }
 0x66f   :  { %v2077_v22 = vpop.f32.mrb[10].mxu0  ;;  %v2148_v36 = vpop.f32.mrb[10].mxu1 }
 0x670   :  { %v2174_v5 = vadd.f32 %v5534_v12, %v2077_v22  ;;  %v2079_v24 = vpop.f32.mrb[11].mxu0  ;;  %v2150_v28 = vpop.f32.mrb[11].mxu1  ;;  %v2176_v22 = vadd.f32 %v5549_v10, %v2148_v36 }
 0x671   :  { %v2175_v43 = vadd.f32 %v5538_v62, %v2079_v24  ;;  %v2177_v2 = vadd.f32 %v5544_v15, %v2150_v28 }
 0x672   :  { %v3402_v13 = vmul.f32 -1.442695, %v2174_v5 }
 0x673   :  { %v3403_v54 = vmul.f32 -1.442695, %v2175_v43  ;;  %v3404_v48 = vmul.f32 -1.442695, %v2177_v2  ;;  %v6096_v2 = vld [vmem:[#allocation35_spill] sm:$0xff] }
 0x674   :  { %4506 = vpow2.f32 %v3402_v13 }
 0x675   :  { %4508 = vpow2.f32 %v3403_v54 }
 0x676   :  { %4510 = vpow2.f32 %v3404_v48 }
 0x677   :  { %4512 = vtanh.f32 %v2176_v22  ;;  %v6098_v22 = vld [vmem:[#allocation37_spill] sm:$0xff] }
 0x67e   :  { %v4507_v12 = vpop.eup %4506 }
 0x67f   :  { %v4509_v32 = vpop.eup %4508  ;;  %v2181_v24 = vadd.f32 1.0, %v4507_v12 }
 0x680   :  { %v2187_v43 = vadd.f32 1.0, %v4509_v32  ;;  %v4511_v40 = vpop.eup %4510  ;;  %v6093_v32 = vld [vmem:[#allocation32_spill] sm:$0xff] }
 0x681   :  { %4514 = vrcp.f32 %v2181_v24  ;;  %v4513_v13 = vpop.eup %4512  ;;  %v2194_v15 = vadd.f32 1.0, %v4511_v40  ;;  %v6099_v24 = vld [vmem:[#allocation38_spill] sm:$0xff]  ;;  %v6101_v40 = vld [vmem:[#allocation40_spill] sm:$0xff] }
 0x682   :  { %4516 = vrcp.f32 %v2187_v43  ;;  %v6100_v43 = vld [vmem:[#allocation39_spill] sm:$0xff] }
 0x683   :  { %4518 = vrcp.f32 %v2194_v15  ;;  %v6094_v15 = vld [vmem:[#allocation33_spill] sm:$0xff] }
 0x68b   :  { %v4515_v54 = vpop.eup %4514 }
 0x68c   :  { %v4517_v5 = vpop.eup %4516  ;;  %v2198_v28 = vmul.f32 %v4515_v54, %v4513_v13  ;;  %v6102_v13 = vld [vmem:[#allocation41_spill] sm:$0xff]  ;;  %v6103_v54 = vld [vmem:[#allocation42_spill] sm:$0xff] }
 0x68d   :  { %v2197_v56 = vmul.f32 %v4517_v5, %v5395_v23  ;;  %v4519_v36 = vpop.eup %4518  ;;  %v6095_v23 = vld [vmem:[#allocation34_spill] sm:$0xff]  ;;  %v6104_v5 = vld [vmem:[#allocation43_spill] sm:$0xff] }
 0x68f   :  { %v5553_v35 = vadd.f32 %v2198_v28, %v2197_v56  ;;  %v3405_v28 = vld [vmem:[%s5977_s1 + $0x8] sm:$0xff] }
 0x690   :  { %v6105_v56 = vld [vmem:[#allocation23_spill] sm:$0xff] }
 0x691   :  { %4520 = vtanh.f32 %v5553_v35 }
 0x69b   :  { %v4521_v12 = vpop.eup %4520 }
 0x69c   :  { %v5556_v48 = vmul.f32 %v4521_v12, %v4519_v36  ;;  %v6106_v36 = vld [vmem:[#allocation24_spill] sm:$0xff]  ;;  %v6107_v12 = vld [vmem:[#allocation25_spill] sm:$0xff] }
 0x69e   :  { %6092 = vst [vmem:[#allocation46_spill] sm:$0xff] %v5556_v48  ;;  %2269 = vmatmul.mubr.f32.vlgmr.msra.gmra.mrb[12].mxu0 %v5556_v48  ;;  %2340 = vmatmul.mubr.f32.vlgmr.msra.gmra.mrb[12].mxu1 %v5556_v48  ;;  %v6109_v48 = vld [vmem:[#allocation27_spill] sm:$0xff] }
 0x69f   :  { %4003 = vmatpush1.bf16.msra.mxu0 %v5398_v29  ;;  %4035 = vmatpush1.bf16.msra.mxu1 %v5400_v34 }
 0x6a0   :  { %4005 = vmatprep.subr.bf16.mxu0 %v5402_v39  ;;  %4037 = vmatprep.subr.bf16.mxu1 %v5404_v1 }
 0x6a1   :  { %2410 = vmatprep.mubr.f32.mxu0 %v6085_v63  ;;  %2481 = vmatprep.mubr.f32.mxu1 %v6085_v63 }
 0x6a3   :  { %4007 = vmatpush1.bf16.msra.mxu0 %v5408_v30  ;;  %4039 = vmatpush1.bf16.msra.mxu1 %v5410_v16 }
 0x6a4   :  { %4009 = vmatprep.subr.bf16.mxu0 %v6093_v32  ;;  %4041 = vmatprep.subr.bf16.mxu1 %v6094_v15 }
 0x6a7   :  { %4011 = vmatpush1.bf16.msra.mxu0 %v6095_v23  ;;  %4043 = vmatpush1.bf16.msra.mxu1 %v6096_v2 }
 0x6a8   :  { %4013 = vmatprep.subr.bf16.mxu0 %v6097_v49  ;;  %4045 = vmatprep.subr.bf16.mxu1 %v6098_v22 }
 0x6ab   :  { %4015 = vmatpush1.bf16.msra.mxu0 %v6099_v24  ;;  %4047 = vmatpush1.bf16.msra.mxu1 %v6100_v43 }
 0x6ac   :  { %4017 = vmatprep.subr.bf16.mxu0 %v6101_v40  ;;  %4049 = vmatprep.subr.bf16.mxu1 %v6102_v13 }
 0x6af   :  { %4019 = vmatpush1.bf16.msra.mxu0 %v6103_v54  ;;  %4051 = vmatpush1.bf16.msra.mxu1 %v6104_v5 }
 0x6b0   :  { %4021 = vmatprep.subr.bf16.mxu0 %v5452_v0  ;;  %4053 = vmatprep.subr.bf16.mxu1 %v5454_v59 }
 0x6b3   :  { %4023 = vmatpush1.bf16.msra.mxu0 %v5458_v51  ;;  %4055 = vmatpush1.bf16.msra.mxu1 %v5460_v60 }
 0x6b4   :  { %4025 = vmatprep.subr.bf16.mxu0 %v5464_v38  ;;  %4057 = vmatprep.subr.bf16.mxu1 %v5466_v46 }
 0x6b7   :  { %4027 = vmatpush1.bf16.msra.mxu0 %v5470_v33  ;;  %4059 = vmatpush1.bf16.msra.mxu1 %v5472_v9 }
 0x6b8   :  { %4029 = vmatprep.subr.bf16.mxu0 %v5476_v61  ;;  %4061 = vmatprep.subr.bf16.mxu1 %v5478_v6 }
 0x6bb   :  { %4031 = vmatpush1.bf16.msra.mxu0 %v5482_v25  ;;  %4063 = vmatpush1.bf16.msra.mxu1 %v5484_v50 }
 0x6bc   :  { %4065 = vmatprep.subr.bf16.mxu0 %v5288_v42  ;;  %4097 = vmatprep.subr.bf16.mxu1 %v5290_v52 }
 0x6be   :  { %2411 = vmatmul.mubr.f32.vlgmr.msra.gmra.mrb[12].mxu0 %v3405_v28  ;;  %2482 = vmatmul.mubr.f32.vlgmr.msra.gmra.mrb[12].mxu1 %v3405_v28  ;;  %v6108_v28 = vld [vmem:[#allocation26_spill] sm:$0xff] }
 0x6bf   :  { %4067 = vmatpush1.bf16.msra.mxu0 %v5292_v53  ;;  %4099 = vmatpush1.bf16.msra.mxu1 %v5295_v45 }
 0x6c0   :  { %4069 = vmatprep.subr.bf16.mxu0 %v5300_v3  ;;  %4101 = vmatprep.subr.bf16.mxu1 %v5302_v14 }
 0x6c1   :  { %2582 = vmatprep.mubr.f32.mxu0 %v6085_v63  ;;  %2653 = vmatprep.mubr.f32.mxu1 %v6085_v63 }
 0x6c3   :  { %4071 = vmatpush1.bf16.msra.mxu0 %v5304_v19  ;;  %4103 = vmatpush1.bf16.msra.mxu1 %v5307_v11 }
 0x6c4   :  { %4073 = vmatprep.subr.bf16.mxu0 %v5312_v4  ;;  %4105 = vmatprep.subr.bf16.mxu1 %v5314_v17 }
 0x6c7   :  { %4075 = vmatpush1.bf16.msra.mxu0 %v5316_v21  ;;  %4107 = vmatpush1.bf16.msra.mxu1 %v5319_v31 }
 0x6c8   :  { %4077 = vmatprep.subr.bf16.mxu0 %v5324_v44  ;;  %4109 = vmatprep.subr.bf16.mxu1 %v5326_v57 }
 0x6cb   :  { %4079 = vmatpush1.bf16.msra.mxu0 %v5328_v58  ;;  %4111 = vmatpush1.bf16.msra.mxu1 %v5331_v7 }
 0x6cc   :  { %4081 = vmatprep.subr.bf16.mxu0 %v5336_v27  ;;  %4113 = vmatprep.subr.bf16.mxu1 %v5338_v41 }
 0x6cf   :  { %4083 = vmatpush1.bf16.msra.mxu0 %v5340_v47  ;;  %4115 = vmatpush1.bf16.msra.mxu1 %v5343_v37  ;;  %v6110_v37 = vld [vmem:[#allocation28_spill] sm:$0xff] }
 0x6d0   :  { %4085 = vmatprep.subr.bf16.mxu0 %v5348_v55  ;;  %4117 = vmatprep.subr.bf16.mxu1 %v5350_v20  ;;  %v6111_v55 = vld [vmem:[#allocation29_spill] sm:$0xff]  ;;  %v6112_v20 = vld [vmem:[#allocation30_spill] sm:$0xff]  ;;  %v6114_v47 = vld [vmem:[#allocation44_spill] sm:$0xff] }
 0x6d3   :  { %4087 = vmatpush1.bf16.msra.mxu0 %v5352_v18  ;;  %4119 = vmatpush1.bf16.msra.mxu1 %v5355_v8  ;;  %v6113_v18 = vld [vmem:[#allocation31_spill] sm:$0xff] }
 0x6d4   :  { %4089 = vmatprep.subr.bf16.mxu0 %v5359_v26  ;;  %4121 = vmatprep.subr.bf16.mxu1 %v6105_v56 }
 0x6d7   :  { %4091 = vmatpush1.bf16.msra.mxu0 %v6106_v36  ;;  %4123 = vmatpush1.bf16.msra.mxu1 %v6107_v12 }
 0x6d8   :  { %4093 = vmatprep.subr.bf16.mxu0 %v6108_v28  ;;  %4125 = vmatprep.subr.bf16.mxu1 %v6109_v48  ;;  %v6115_v48 = vld [vmem:[#allocation45_spill] sm:$0xff] }
 0x6db   :  { %4095 = vmatpush1.bf16.msra.mxu0 %v6110_v37  ;;  %4127 = vmatpush1.bf16.msra.mxu1 %v6111_v55 }
 0x6dc   :  { %4129 = vmatprep.subr.bf16.mxu0 %v6112_v20  ;;  %4161 = vmatprep.subr.bf16.mxu1 %v6113_v18 }
 0x791   :  { %v2412_v8 = vpop.f32.mrb[12].mxu0  ;;  %v2483_v26 = vpop.f32.mrb[12].mxu1 }
 0x792   :  { %v2488_v56 = vadd.f32 %v2412_v8, %v6114_v47  ;;  %v2414_v41 = vpop.f32.mrb[13].mxu0  ;;  %v2485_v36 = vpop.f32.mrb[13].mxu1  ;;  %v2490_v55 = vadd.f32 %v2483_v26, %v5549_v10  ;;  %v6133_v26 = vld [vmem:[#allocation28_spill] sm:$0xff] }
 0x793   :  { %v2489_v12 = vadd.f32 %v2414_v41, %v5538_v62  ;;  %v2491_v37 = vadd.f32 %v2485_v36, %v6115_v48 }
 0x794   :  { %v3406_v27 = vmul.f32 -1.442695, %v2488_v56 }
 0x795   :  { %v3407_v28 = vmul.f32 -1.442695, %v2489_v12  ;;  %v3408_v7 = vmul.f32 -1.442695, %v2491_v37 }
 0x796   :  { %4522 = vpow2.f32 %v3406_v27 }
 0x797   :  { %4524 = vpow2.f32 %v3407_v28 }
 0x798   :  { %4526 = vpow2.f32 %v3408_v7 }
 0x799   :  { %4528 = vtanh.f32 %v2490_v55  ;;  %v6131_v55 = vld [vmem:[#allocation26_spill] sm:$0xff] }
 0x7a0   :  { %v4523_v20 = vpop.eup %4522 }
 0x7a1   :  { %v4525_v58 = vpop.eup %4524  ;;  %v2495_v18 = vadd.f32 1.0, %v4523_v20 }
 0x7a2   :  { %v2501_v57 = vadd.f32 1.0, %v4525_v58  ;;  %v4527_v8 = vpop.eup %4526  ;;  %v6129_v58 = vld [vmem:[#allocation24_spill] sm:$0xff] }
 0x7a3   :  { %4530 = vrcp.f32 %v2495_v18  ;;  %v4529_v47 = vpop.eup %4528  ;;  %v2508_v27 = vadd.f32 1.0, %v4527_v8  ;;  %v6132_v18 = vld [vmem:[#allocation27_spill] sm:$0xff]  ;;  %v6135_v8 = vld [vmem:[#allocation30_spill] sm:$0xff] }
 0x7a4   :  { %4532 = vrcp.f32 %v2501_v57  ;;  %v3409_v57 = vld [vmem:[%s5977_s1 + $0x10] sm:$0xff] }
 0x7a5   :  { %4534 = vrcp.f32 %v2508_v27  ;;  %v6137_v27 = vld [vmem:[#allocation44_spill] sm:$0xff] }
 0x7ad   :  { %v4531_v41 = vpop.eup %4530 }
 0x7ae   :  { %v4533_v56 = vpop.eup %4532  ;;  %v2512_v12 = vmul.f32 %v4531_v41, %v4529_v47  ;;  %v6130_v47 = vld [vmem:[#allocation25_spill] sm:$0xff]  ;;  %v6136_v41 = vld [vmem:[#allocation31_spill] sm:$0xff] }
 0x7af   :  { %v2511_v28 = vmul.f32 %v4533_v56, %v5553_v35  ;;  %v4535_v37 = vpop.eup %4534  ;;  %v6134_v35 = vld [vmem:[#allocation29_spill] sm:$0xff] }
 0x7b1   :  { %v5636_v36 = vadd.f32 %v2512_v12, %v2511_v28 }
 0x7b3   :  { %4536 = vtanh.f32 %v5636_v36 }
 0x7bd   :  { %v4537_v20 = vpop.eup %4536 }
 0x7be   :  { %v5639_v7 = vmul.f32 %v4537_v20, %v4535_v37 }
 0x7c0   :  { %2583 = vmatmul.mubr.f32.vlgmr.msra.gmra.mrb[14].mxu0 %v5639_v7  ;;  %2654 = vmatmul.mubr.f32.vlgmr.msra.gmra.mrb[14].mxu1 %v5639_v7 }
 0x7c1   :  { %4131 = vmatpush1.bf16.msra.mxu0 %v5398_v29  ;;  %4163 = vmatpush1.bf16.msra.mxu1 %v5400_v34 }
 0x7c2   :  { %4133 = vmatprep.subr.bf16.mxu0 %v5402_v39  ;;  %4165 = vmatprep.subr.bf16.mxu1 %v5404_v1 }
 0x7c3   :  { %2724 = vmatprep.mubr.f32.mxu0 %v6085_v63  ;;  %2795 = vmatprep.mubr.f32.mxu1 %v6085_v63 }
 0x7c5   :  { %4135 = vmatpush1.bf16.msra.mxu0 %v5408_v30  ;;  %4167 = vmatpush1.bf16.msra.mxu1 %v5410_v16 }
 0x7c6   :  { %4137 = vmatprep.subr.bf16.mxu0 %v6093_v32  ;;  %4169 = vmatprep.subr.bf16.mxu1 %v6094_v15 }
 0x7c9   :  { %4139 = vmatpush1.bf16.msra.mxu0 %v6095_v23  ;;  %4171 = vmatpush1.bf16.msra.mxu1 %v6096_v2 }
 0x7ca   :  { %4141 = vmatprep.subr.bf16.mxu0 %v6097_v49  ;;  %4173 = vmatprep.subr.bf16.mxu1 %v6098_v22 }
 0x7cd   :  { %4143 = vmatpush1.bf16.msra.mxu0 %v6099_v24  ;;  %4175 = vmatpush1.bf16.msra.mxu1 %v6100_v43 }
 0x7ce   :  { %4145 = vmatprep.subr.bf16.mxu0 %v6101_v40  ;;  %4177 = vmatprep.subr.bf16.mxu1 %v6102_v13 }
 0x7d1   :  { %4147 = vmatpush1.bf16.msra.mxu0 %v6103_v54  ;;  %4179 = vmatpush1.bf16.msra.mxu1 %v6104_v5 }
 0x7d2   :  { %4149 = vmatprep.subr.bf16.mxu0 %v5452_v0  ;;  %4181 = vmatprep.subr.bf16.mxu1 %v5454_v59 }
 0x7d5   :  { %4151 = vmatpush1.bf16.msra.mxu0 %v5458_v51  ;;  %4183 = vmatpush1.bf16.msra.mxu1 %v5460_v60 }
 0x7d6   :  { %4153 = vmatprep.subr.bf16.mxu0 %v5464_v38  ;;  %4185 = vmatprep.subr.bf16.mxu1 %v5466_v46 }
 0x7d9   :  { %4155 = vmatpush1.bf16.msra.mxu0 %v5470_v33  ;;  %4187 = vmatpush1.bf16.msra.mxu1 %v5472_v9 }
 0x7da   :  { %4157 = vmatprep.subr.bf16.mxu0 %v5476_v61  ;;  %4189 = vmatprep.subr.bf16.mxu1 %v5478_v6 }
 0x7dd   :  { %4159 = vmatpush1.bf16.msra.mxu0 %v5482_v25  ;;  %4191 = vmatpush1.bf16.msra.mxu1 %v5484_v50 }
 0x7de   :  { %4193 = vmatprep.subr.bf16.mxu0 %v5288_v42  ;;  %4225 = vmatprep.subr.bf16.mxu1 %v5290_v52  ;;  %v6116_v42 = vld [vmem:[#allocation11_spill] sm:$0xff]  ;;  %v6117_v52 = vld [vmem:[#allocation12_spill] sm:$0xff] }
 0x7e0   :  { %2725 = vmatmul.mubr.f32.vlgmr.msra.gmra.mrb[14].mxu0 %v3409_v57  ;;  %2796 = vmatmul.mubr.f32.vlgmr.msra.gmra.mrb[14].mxu1 %v3409_v57 }
 0x7e1   :  { %4195 = vmatpush1.bf16.msra.mxu0 %v5292_v53  ;;  %4227 = vmatpush1.bf16.msra.mxu1 %v5295_v45  ;;  %v6118_v53 = vld [vmem:[#allocation13_spill] sm:$0xff]  ;;  %v6119_v45 = vld [vmem:[#allocation14_spill] sm:$0xff] }
 0x7e2   :  { %4197 = vmatprep.subr.bf16.mxu0 %v5300_v3  ;;  %4229 = vmatprep.subr.bf16.mxu1 %v5302_v14  ;;  %v6120_v3 = vld [vmem:[#allocation15_spill] sm:$0xff]  ;;  %v6121_v14 = vld [vmem:[#allocation16_spill] sm:$0xff] }
 0x7e3   :  { %2896 = vmatprep.mubr.f32.mxu0 %v6085_v63  ;;  %2967 = vmatprep.mubr.f32.mxu1 %v6085_v63 }
 0x7e5   :  { %4199 = vmatpush1.bf16.msra.mxu0 %v5304_v19  ;;  %4231 = vmatpush1.bf16.msra.mxu1 %v5307_v11  ;;  %v6122_v19 = vld [vmem:[#allocation17_spill] sm:$0xff]  ;;  %v6123_v11 = vld [vmem:[#allocation18_spill] sm:$0xff] }
 0x7e6   :  { %4201 = vmatprep.subr.bf16.mxu0 %v5312_v4  ;;  %4233 = vmatprep.subr.bf16.mxu1 %v5314_v17  ;;  %v6124_v4 = vld [vmem:[#allocation19_spill] sm:$0xff]  ;;  %v6125_v17 = vld [vmem:[#allocation20_spill] sm:$0xff] }
 0x7e9   :  { %4203 = vmatpush1.bf16.msra.mxu0 %v5316_v21  ;;  %4235 = vmatpush1.bf16.msra.mxu1 %v5319_v31  ;;  %v6126_v21 = vld [vmem:[#allocation21_spill] sm:$0xff]  ;;  %v6127_v31 = vld [vmem:[#allocation22_spill] sm:$0xff] }
 0x7ea   :  { %4205 = vmatprep.subr.bf16.mxu0 %v5324_v44  ;;  %4237 = vmatprep.subr.bf16.mxu1 %v6116_v42  ;;  %v6128_v44 = vld [vmem:[#allocation23_spill] sm:$0xff] }
 0x7ed   :  { %4207 = vmatpush1.bf16.msra.mxu0 %v6117_v52  ;;  %4239 = vmatpush1.bf16.msra.mxu1 %v6118_v53 }
 0x7ee   :  { %4209 = vmatprep.subr.bf16.mxu0 %v6119_v45  ;;  %4241 = vmatprep.subr.bf16.mxu1 %v6120_v3 }
 0x7f1   :  { %4211 = vmatpush1.bf16.msra.mxu0 %v6121_v14  ;;  %4243 = vmatpush1.bf16.msra.mxu1 %v6122_v19 }
 0x7f2   :  { %4213 = vmatprep.subr.bf16.mxu0 %v6123_v11  ;;  %4245 = vmatprep.subr.bf16.mxu1 %v6124_v4 }
 0x7f5   :  { %4215 = vmatpush1.bf16.msra.mxu0 %v6125_v17  ;;  %4247 = vmatpush1.bf16.msra.mxu1 %v6126_v21 }
 0x7f6   :  { %4217 = vmatprep.subr.bf16.mxu0 %v6127_v31  ;;  %4249 = vmatprep.subr.bf16.mxu1 %v6128_v44 }
 0x7f9   :  { %4219 = vmatpush1.bf16.msra.mxu0 %v6129_v58  ;;  %4251 = vmatpush1.bf16.msra.mxu1 %v6130_v47 }
 0x7fa   :  { %4221 = vmatprep.subr.bf16.mxu0 %v6131_v55  ;;  %4253 = vmatprep.subr.bf16.mxu1 %v6132_v18 }
 0x7fd   :  { %4223 = vmatpush1.bf16.msra.mxu0 %v6133_v26  ;;  %4255 = vmatpush1.bf16.msra.mxu1 %v6134_v35 }
 0x7fe   :  { %4257 = vmatprep.subr.bf16.mxu0 %v6135_v8  ;;  %4289 = vmatprep.subr.bf16.mxu1 %v6136_v41 }
 0x8b3   :  { %v2726_v56 = vpop.f32.mrb[14].mxu0  ;;  %v2797_v12 = vpop.f32.mrb[14].mxu1 }
 0x8b4   :  { %v2802_v28 = vadd.f32 %v2726_v56, %v6137_v27  ;;  %v2728_v37 = vpop.f32.mrb[15].mxu0  ;;  %v2799_v20 = vpop.f32.mrb[15].mxu1  ;;  %v2804_v3 = vadd.f32 %v2797_v12, %v5549_v10  ;;  %v3154_v56 = vld [vmem:[%s5984_s8 + $0x50] sm:$0xff]  ;;  %v3155_v12 = vld [vmem:[%s5984_s8 + $0x58] sm:$0xff] }
 0x8b5   :  { %v2803_v57 = vadd.f32 %v2728_v37, %v5538_v62  ;;  %v2805_v53 = vadd.f32 %v2799_v20, %v6115_v48  ;;  %v3173_v37 = vld [vmem:[%s5984_s8 + $0xe8] sm:$0xff]  ;;  %v4342_v20 = vpack.c.bf16 %v3155_v12, %v3154_v56  ;;  %v3207_v56 = vld [vmem:[%s5984_s8 + $0x1f8] sm:$0xff] }
 0x8b6   :  { %v3410_v42 = vmul.f32 -1.442695, %v2802_v28  ;;  %v3172_v28 = vld [vmem:[%s5984_s8 + $0xe0] sm:$0xff] }
 0x8b7   :  { %v3411_v52 = vmul.f32 -1.442695, %v2803_v57  ;;  %v3412_v45 = vmul.f32 -1.442695, %v2805_v53  ;;  %v4344_v57 = vpack.c.bf16 %v3173_v37, %v3172_v28  ;;  %v3174_v53 = vld [vmem:[%s5984_s8 + $0xf0] sm:$0xff] }
 0x8b8   :  { %4538 = vpow2.f32 %v3410_v42  ;;  %v3156_v42 = vld [vmem:[%s5984_s8 + $0x60] sm:$0xff]  ;;  %v3190_v37 = vld [vmem:[%s5984_s8 + $0x170] sm:$0xff] }
 0x8b9   :  { %4540 = vpow2.f32 %v3411_v52  ;;  %v3157_v52 = vld [vmem:[%s5984_s8 + $0x68] sm:$0xff] }
 0x8ba   :  { %4542 = vpow2.f32 %v3412_v45  ;;  %v3175_v45 = vld [vmem:[%s5984_s8 + $0xf8] sm:$0xff] }
 0x8bb   :  { %4544 = vtanh.f32 %v2804_v3  ;;  %v4346_v3 = vpack.c.bf16 %v3157_v52, %v3156_v42 }
 0x8c2   :  { %v4539_v14 = vpop.eup %4538 }
 0x8c3   :  { %v4541_v19 = vpop.eup %4540  ;;  %v2809_v11 = vadd.f32 1.0, %v4539_v14  ;;  %v4348_v14 = vpack.c.bf16 %v3175_v45, %v3174_v53 }
 0x8c4   :  { %v2815_v4 = vadd.f32 1.0, %v4541_v19  ;;  %v4543_v17 = vpop.eup %4542  ;;  %v3158_v19 = vld [vmem:[%s5984_s8 + $0x70] sm:$0xff] }
 0x8c5   :  { %4546 = vrcp.f32 %v2809_v11  ;;  %v4545_v21 = vpop.eup %4544  ;;  %v2822_v47 = vadd.f32 1.0, %v4543_v17  ;;  %v3159_v11 = vld [vmem:[%s5984_s8 + $0x78] sm:$0xff]  ;;  %v6138_v17 = vld [vmem:[#allocation46_spill] sm:$0xff] }
 0x8c6   :  { %4548 = vrcp.f32 %v2815_v4  ;;  %v4350_v4 = vpack.c.bf16 %v3159_v11, %v3158_v19 }
 0x8c7   :  { %4550 = vrcp.f32 %v2822_v47  ;;  %v3177_v47 = vld [vmem:[%s5984_s8 + $0x108] sm:$0xff] }
 0x8cf   :  { %v4547_v31 = vpop.eup %4546 }
 0x8d0   :  { %v4549_v44 = vpop.eup %4548  ;;  %v2826_v58 = vmul.f32 %v4547_v31, %v4545_v21  ;;  %v3192_v21 = vld [vmem:[%s5984_s8 + $0x180] sm:$0xff]  ;;  %v3193_v31 = vld [vmem:[%s5984_s8 + $0x188] sm:$0xff] }
 0x8d1   :  { %v2825_v55 = vmul.f32 %v4549_v44, %v5636_v36  ;;  %v4551_v26 = vpop.eup %4550  ;;  %v3171_v36 = vld [vmem:[%s5984_s8 + $0xd8] sm:$0xff]  ;;  %v4352_v44 = vpack.c.bf16 %v3193_v31, %v3192_v21 }
 0x8d3   :  { %v5719_v18 = vadd.f32 %v2826_v58, %v2825_v55  ;;  %v3176_v58 = vld [vmem:[%s5984_s8 + $0x100] sm:$0xff] }
 0x8d4   :  { %v4354_v55 = vpack.c.bf16 %v3177_v47, %v3176_v58 }
 0x8d5   :  { %4552 = vtanh.f32 %v5719_v18 }
 0x8df   :  { %v4553_v35 = vpop.eup %4552 }
 0x8e0   :  { %v5722_v8 = vmul.f32 %v4553_v35, %v4551_v26  ;;  %v3194_v26 = vld [vmem:[%s5984_s8 + $0x190] sm:$0xff]  ;;  %v3195_v35 = vld [vmem:[%s5984_s8 + $0x198] sm:$0xff] }
 0x8e2   :  { %2897 = vmatmul.mubr.f32.vlgmr.msra.gmra.mrb[16].mxu0 %v5722_v8  ;;  %2968 = vmatmul.mubr.f32.vlgmr.msra.gmra.mrb[16].mxu1 %v5722_v8 }
 0x8e3   :  { %4259 = vmatpush1.bf16.msra.mxu0 %v5398_v29  ;;  %4291 = vmatpush1.bf16.msra.mxu1 %v5400_v34  ;;  %v3160_v29 = vld [vmem:[%s5984_s8 + $0x80] sm:$0xff]  ;;  %v3161_v34 = vld [vmem:[%s5984_s8 + $0x88] sm:$0xff] }
 0x8e4   :  { %4261 = vmatprep.subr.bf16.mxu0 %v5402_v39  ;;  %4293 = vmatprep.subr.bf16.mxu1 %v5404_v1  ;;  %v4320_v39 = vpack.c.bf16 %v3161_v34, %v3160_v29  ;;  %v3144_v1 = vld [vmem:[%s5984_s8] sm:$0xff]  ;;  %v4356_v29 = vpack.c.bf16 %v3195_v35, %v3194_v26  ;;  %v3178_v34 = vld [vmem:[%s5984_s8 + $0x110] sm:$0xff] }
 0x8e5   :  { %3038 = vmatprep.mubr.f32.mxu0 %v6085_v63  ;;  %3109 = vmatprep.mubr.f32.mxu1 %v6085_v63  ;;  %v3166_v63 = vld [vmem:[%s5984_s8 + $0xb0] sm:$0xff] }
 0x8e7   :  { %4263 = vmatpush1.bf16.msra.mxu0 %v5408_v30  ;;  %4295 = vmatpush1.bf16.msra.mxu1 %v5410_v16  ;;  %v3145_v30 = vld [vmem:[%s5984_s8 + $0x8] sm:$0xff]  ;;  %v3162_v16 = vld [vmem:[%s5984_s8 + $0x90] sm:$0xff] }
 0x8e8   :  { %4265 = vmatprep.subr.bf16.mxu0 %v6093_v32  ;;  %4297 = vmatprep.subr.bf16.mxu1 %v6094_v15  ;;  %v3167_v32 = vld [vmem:[%s5984_s8 + $0xb8] sm:$0xff] }
 0x8eb   :  { %4267 = vmatpush1.bf16.msra.mxu0 %v6095_v23  ;;  %4299 = vmatpush1.bf16.msra.mxu1 %v6096_v2  ;;  %v4332_v23 = vpack.c.bf16 %v3167_v32, %v3166_v63  ;;  %v3150_v2 = vld [vmem:[%s5984_s8 + $0x30] sm:$0xff]  ;;  %v3184_v32 = vld [vmem:[%s5984_s8 + $0x140] sm:$0xff] }
 0x8ec   :  { %4269 = vmatprep.subr.bf16.mxu0 %v6097_v49  ;;  %4301 = vmatprep.subr.bf16.mxu1 %v6098_v22  ;;  %v3151_v49 = vld [vmem:[%s5984_s8 + $0x38] sm:$0xff]  ;;  %v3168_v22 = vld [vmem:[%s5984_s8 + $0xc0] sm:$0xff] }
 0x8ef   :  { %4271 = vmatpush1.bf16.msra.mxu0 %v6099_v24  ;;  %4303 = vmatpush1.bf16.msra.mxu1 %v6100_v43  ;;  %v3169_v24 = vld [vmem:[%s5984_s8 + $0xc8] sm:$0xff]  ;;  %v4334_v43 = vpack.c.bf16 %v3151_v49, %v3150_v2  ;;  %v3202_v2 = vld [vmem:[%s5984_s8 + $0x1d0] sm:$0xff]  ;;  %v3203_v49 = vld [vmem:[%s5984_s8 + $0x1d8] sm:$0xff] }
 0x8f0   :  { %4273 = vmatprep.subr.bf16.mxu0 %v6101_v40  ;;  %4305 = vmatprep.subr.bf16.mxu1 %v6102_v13  ;;  %v4336_v40 = vpack.c.bf16 %v3169_v24, %v3168_v22  ;;  %v3152_v13 = vld [vmem:[%s5984_s8 + $0x40] sm:$0xff]  ;;  %v4372_v22 = vpack.c.bf16 %v3203_v49, %v3202_v2  ;;  %v3186_v24 = vld [vmem:[%s5984_s8 + $0x150] sm:$0xff] }
 0x8f3   :  { %4275 = vmatpush1.bf16.msra.mxu0 %v6103_v54  ;;  %4307 = vmatpush1.bf16.msra.mxu1 %v6104_v5  ;;  %v3153_v54 = vld [vmem:[%s5984_s8 + $0x48] sm:$0xff]  ;;  %v3170_v5 = vld [vmem:[%s5984_s8 + $0xd0] sm:$0xff] }
 0x8f4   :  { %4277 = vmatprep.subr.bf16.mxu0 %v5452_v0  ;;  %4309 = vmatprep.subr.bf16.mxu1 %v5454_v59  ;;  %v3163_v0 = vld [vmem:[%s5984_s8 + $0x98] sm:$0xff]  ;;  %v4340_v41 = vpack.c.bf16 %v3171_v36, %v3170_v5  ;;  %v3188_v5 = vld [vmem:[%s5984_s8 + $0x160] sm:$0xff] }
 0x8f5   :  { %v3413_v59 = vld [vmem:[%s5977_s1 + $0x18] sm:$0xff] }
 0x8f7   :  { %4279 = vmatpush1.bf16.msra.mxu0 %v5458_v51  ;;  %4311 = vmatpush1.bf16.msra.mxu1 %v5460_v60  ;;  %v4322_v51 = vpack.c.bf16 %v3145_v30, %v3144_v1  ;;  %v4324_v60 = vpack.c.bf16 %v3163_v0, %v3162_v16  ;;  %v3196_v30 = vld [vmem:[%s5984_s8 + $0x1a0] sm:$0xff]  ;;  %v3197_v16 = vld [vmem:[%s5984_s8 + $0x1a8] sm:$0xff] }
 0x8f8   :  { %4281 = vmatprep.subr.bf16.mxu0 %v5464_v38  ;;  %4313 = vmatprep.subr.bf16.mxu1 %v5466_v46  ;;  %v3146_v38 = vld [vmem:[%s5984_s8 + $0x10] sm:$0xff]  ;;  %v3147_v46 = vld [vmem:[%s5984_s8 + $0x18] sm:$0xff]  ;;  %v4360_v0 = vpack.c.bf16 %v3197_v16, %v3196_v30 }
 0x8fb   :  { %4283 = vmatpush1.bf16.msra.mxu0 %v5470_v33  ;;  %4315 = vmatpush1.bf16.msra.mxu1 %v5472_v9  ;;  %v3164_v33 = vld [vmem:[%s5984_s8 + $0xa0] sm:$0xff]  ;;  %v3165_v9 = vld [vmem:[%s5984_s8 + $0xa8] sm:$0xff] }
 0x8fc   :  { %4285 = vmatprep.subr.bf16.mxu0 %v5476_v61  ;;  %4317 = vmatprep.subr.bf16.mxu1 %v5478_v6  ;;  %v4326_v61 = vpack.c.bf16 %v3147_v46, %v3146_v38  ;;  %v4328_v6 = vpack.c.bf16 %v3165_v9, %v3164_v33  ;;  %v3198_v38 = vld [vmem:[%s5984_s8 + $0x1b0] sm:$0xff]  ;;  %v3199_v46 = vld [vmem:[%s5984_s8 + $0x1b8] sm:$0xff] }
 0x8fd   :  { %v4364_v33 = vpack.c.bf16 %v3199_v46, %v3198_v38  ;;  %v3182_v9 = vld [vmem:[%s5984_s8 + $0x130] sm:$0xff] }
 0x8ff   :  { %4287 = vmatpush1.bf16.msra.mxu0 %v5482_v25  ;;  %4319 = vmatpush1.bf16.msra.mxu1 %v5484_v50  ;;  %v3148_v25 = vld [vmem:[%s5984_s8 + $0x20] sm:$0xff]  ;;  %v3149_v50 = vld [vmem:[%s5984_s8 + $0x28] sm:$0xff] }
 0x900   :  { %4321 = vmatprep.subr.bf16.mxu0 %v4320_v39  ;;  %v4330_v15 = vpack.c.bf16 %v3149_v50, %v3148_v25  ;;  %4353 = vmatprep.subr.bf16.mxu1 %v4352_v44  ;;  %v3179_v39 = vld [vmem:[%s5984_s8 + $0x118] sm:$0xff]  ;;  %v3200_v25 = vld [vmem:[%s5984_s8 + $0x1c0] sm:$0xff]  ;;  %v3201_v50 = vld [vmem:[%s5984_s8 + $0x1c8] sm:$0xff] }
 0x901   :  { %v4358_v1 = vpack.c.bf16 %v3179_v39, %v3178_v34  ;;  %v4368_v63 = vpack.c.bf16 %v3201_v50, %v3200_v25 }
 0x902   :  { %3039 = vmatmul.mubr.f32.vlgmr.msra.gmra.mrb[16].mxu0 %v3413_v59  ;;  %3110 = vmatmul.mubr.f32.vlgmr.msra.gmra.mrb[16].mxu1 %v3413_v59  ;;  %v3180_v59 = vld [vmem:[%s5984_s8 + $0x120] sm:$0xff] }
 0x903   :  { %4323 = vmatpush3.bf16.msra.mxu0 %v4322_v51  ;;  %3279 = vmatprep.mubr.f32.mxu0 %v5639_v7  ;;  %v4338_v7 = vpack.c.bf16 %v3153_v54, %v3152_v13  ;;  %v3181_v51 = vld [vmem:[%s5984_s8 + $0x128] sm:$0xff]  ;;  %v3204_v13 = vld [vmem:[%s5984_s8 + $0x1e0] sm:$0xff] }
 0x904   :  { %4325 = vmatprep.subr.bf16.mxu0 %v4324_v60  ;;  %4355 = vmatpush3.bf16.msra.mxu1 %v4354_v55  ;;  %v4362_v60 = vpack.c.bf16 %v3181_v51, %v3180_v59  ;;  %v3205_v54 = vld [vmem:[%s5984_s8 + $0x1e8] sm:$0xff]  ;;  %v3417_v59 = vld [vmem:[%s5985_s9] ss:$0 sm:$0xff] }
 0x905   :  { %4357 = vmatprep.subr.bf16.mxu1 %v4356_v29  ;;  %v4376_v36 = vpack.c.bf16 %v3205_v54, %v3204_v13 }
 0x907   :  { %4327 = vmatpush3.bf16.msra.mxu0 %v4326_v61  ;;  %v3183_v61 = vld [vmem:[%s5984_s8 + $0x138] sm:$0xff] }
 0x908   :  { %4329 = vmatprep.subr.bf16.mxu0 %v4328_v6  ;;  %4359 = vmatpush3.bf16.msra.mxu1 %v4358_v1  ;;  %v4366_v6 = vpack.c.bf16 %v3183_v61, %v3182_v9 }
 0x909   :  { %4361 = vmatprep.subr.bf16.mxu1 %v4360_v0 }
 0x90b   :  { %4331 = vmatpush3.bf16.msra.mxu0 %v4330_v15  ;;  %v3185_v15 = vld [vmem:[%s5984_s8 + $0x148] sm:$0xff] }
 0x90c   :  { %4333 = vmatprep.subr.bf16.mxu0 %v4332_v23  ;;  %4363 = vmatpush3.bf16.msra.mxu1 %v4362_v60  ;;  %v4370_v23 = vpack.c.bf16 %v3185_v15, %v3184_v32 }
 0x90d   :  { %4365 = vmatprep.subr.bf16.mxu1 %v4364_v33 }
 0x90f   :  { %4335 = vmatpush3.bf16.msra.mxu0 %v4334_v43  ;;  %v3187_v43 = vld [vmem:[%s5984_s8 + $0x158] sm:$0xff] }
 0x910   :  { %4337 = vmatprep.subr.bf16.mxu0 %v4336_v40  ;;  %4367 = vmatpush3.bf16.msra.mxu1 %v4366_v6  ;;  %v4374_v40 = vpack.c.bf16 %v3187_v43, %v3186_v24 }
 0x911   :  { %4369 = vmatprep.subr.bf16.mxu1 %v4368_v63 }
 0x913   :  { %4339 = vmatpush3.bf16.msra.mxu0 %v4338_v7  ;;  %v3189_v7 = vld [vmem:[%s5984_s8 + $0x168] sm:$0xff] }
 0x914   :  { %4341 = vmatprep.subr.bf16.mxu0 %v4340_v41  ;;  %4371 = vmatpush3.bf16.msra.mxu1 %v4370_v23  ;;  %v3206_v41 = vld [vmem:[%s5984_s8 + $0x1f0] sm:$0xff]  ;;  %v4378_v12 = vpack.c.bf16 %v3189_v7, %v3188_v5 }
 0x915   :  { %4373 = vmatprep.subr.bf16.mxu1 %v4372_v22  ;;  %v4380_v28 = vpack.c.bf16 %v3207_v56, %v3206_v41 }
 0x917   :  { %4343 = vmatpush3.bf16.msra.mxu0 %v4342_v20  ;;  %v3191_v20 = vld [vmem:[%s5984_s8 + $0x178] sm:$0xff] }
 0x918   :  { %4345 = vmatprep.subr.bf16.mxu0 %v4344_v57  ;;  %4375 = vmatpush3.bf16.msra.mxu1 %v4374_v40  ;;  %v4382_v57 = vpack.c.bf16 %v3191_v20, %v3190_v37 }
 0x919   :  { %4377 = vmatprep.subr.bf16.mxu1 %v4376_v36 }
 0x91b   :  { %4347 = vmatpush3.bf16.msra.mxu0 %v4346_v3 }
 0x91c   :  { %4349 = vmatprep.subr.bf16.mxu0 %v4348_v14  ;;  %4379 = vmatpush3.bf16.msra.mxu1 %v4378_v12 }
 0x91d   :  { %4381 = vmatprep.subr.bf16.mxu1 %v4380_v28 }
 0x91f   :  { %4351 = vmatpush3.bf16.msra.mxu0 %v4350_v4 }
 0x920   :  { %4383 = vmatpush3.bf16.msra.mxu1 %v4382_v57 }
 0x922   :  { %3280 = vmatmul.mubr.f32.vlgmr.msra.gmra.mrb[18].mxu0 %v6138_v17 }
 0x9d5   :  { %v3040_v42 = vpop.f32.mrb[16].mxu0  ;;  %v3111_v52 = vpop.f32.mrb[16].mxu1 }
 0x9d6   :  { %v3116_v53 = vadd.f32 %v3040_v42, %v6137_v27  ;;  %v3042_v45 = vpop.f32.mrb[17].mxu0  ;;  %v3113_v3 = vpop.f32.mrb[17].mxu1  ;;  %v3118_v21 = vadd.f32 %v3111_v52, %v5549_v10 }
 0x9d7   :  { %v3117_v14 = vadd.f32 %v3042_v45, %v5538_v62  ;;  %v3119_v4 = vadd.f32 %v3113_v3, %v6115_v48 }
 0x9d8   :  { %v3414_v19 = vmul.f32 -1.442695, %v3116_v53 }
 0x9d9   :  { %v3415_v11 = vmul.f32 -1.442695, %v3117_v14  ;;  %v3416_v17 = vmul.f32 -1.442695, %v3119_v4 }
 0x9da   :  { %4554 = vpow2.f32 %v3414_v19 }
 0x9db   :  { %4556 = vpow2.f32 %v3415_v11 }
 0x9dc   :  { %4558 = vpow2.f32 %v3416_v17 }
 0x9dd   :  { %4560 = vtanh.f32 %v3118_v21 }
 0x9e4   :  { %v4555_v31 = vpop.eup %4554 }
 0x9e5   :  { %v4557_v44 = vpop.eup %4556  ;;  %v3123_v58 = vadd.f32 1.0, %v4555_v31 }
 0x9e6   :  { %v3129_v47 = vadd.f32 1.0, %v4557_v44  ;;  %v4559_v27 = vpop.eup %4558 }
 0x9e7   :  { %4562 = vrcp.f32 %v3123_v58  ;;  %v4561_v55 = vpop.eup %4560  ;;  %v3136_v29 = vadd.f32 1.0, %v4559_v27 }
 0x9e8   :  { %4564 = vrcp.f32 %v3129_v47 }
 0x9e9   :  { %4566 = vrcp.f32 %v3136_v29 }
 0x9f1   :  { %v4563_v62 = vpop.eup %4562 }
 0x9f2   :  { %v4565_v26 = vpop.eup %4564  ;;  %v3140_v35 = vmul.f32 %v4563_v62, %v4561_v55 }
 0x9f3   :  { %v3139_v34 = vmul.f32 %v4565_v26, %v5719_v18  ;;  %v4567_v30 = vpop.eup %4566 }
 0x9f5   :  { %v3450_v48 = vpop.f32.mrb[18].mxu0  ;;  %v3141_v39 = vadd.f32 %v3140_v35, %v3139_v34 }
 0x9f6   :  { %v3451_v10 = vpop.f32.mrb[19].mxu0 }
 0x9f7   :  { %v3452_v1 = vadd.f32 %v3451_v10, %v3450_v48  ;;  %4568 = vtanh.f32 %v3141_v39 }
 0x9f9   :  { %v3282_v18 = vadd.f32 %v3452_v1, %v3417_v59 }
 0xa01   :  { %v4569_v16 = vpop.eup %4568 }
 0xa02   :  { %v3143_v0 = vmul.f32 %v4569_v16, %v4567_v30 }
 0xa04   :  { %3349 = vmatprep.mubr.f32.mxu1 %v3143_v0 }
 0xa05   :  { %3350 = vmatmul.mubr.f32.vlgmr.msra.gmra.mrb[18].mxu1 %v5722_v8 }
 0xad8   :  { %v3485_v51 = vpop.f32.mrb[18].mxu1 }
 0xad9   :  { %v3486_v60 = vpop.f32.mrb[19].mxu1 }
 0xada   :  { %v3487_v38 = vadd.f32 %v3486_v60, %v3485_v51 }
 0xadc   :  { %v3352_v46 = vadd.f32 %v3487_v38, %v3282_v18 }
 0xade   :  { %3356 = vst.msk [vmem:[#allocation7] sm:$0xff] %vm3355_vm1, %v3352_v46 }
 0xadf   :  { %4625 = shalt.err (!%p4622_p6)
}
 0xae0   :  { %s4626_s9 = scalar_lea.hbm %s5986_s10, 128 }
 0xae1   :  { %p4627_p7 = scmp.ne.s32.totalorder %s5986_s10, %s4626_s9  ;;  %p4630_p8 = scmp.lt.u32.totalorder %s4626_s9, %s5986_s10 }
 0xae3   :  { %p4632_p9 = pnand %p4630_p8, %p4627_p7 }
 0xae5   :  { %4635 = shalt.err (!%p4632_p9)
}
 0xae6   :  { %3366 = dma.vmem_to_hbm [thread:$0]  %s3364_s30, 128, %s5986_s10, [#allocation4]  }
 0xae7   :  { %4640 = dma.done.wait [#allocation4], 128  }
 0xae8   :  { %4641 = vsyncadd [#allocation4], 4294967168 }
 0xae9   :  { %3370 = vsyncpa [#allocation3], 1 }
 0xaea   :  { %3371 = vsyncpa [#allocation6], 1 }
 0xaeb   :  { %3372 = vsyncpa [#allocation4], 1 }

</bundles_post_ra>
